<compile_context>
chip_gen: v7x
topology: tpu7x:2x2x1
jax: 0.10.0
libtpu: 0.0.40
codegen_flags: <defaults>
</compile_context>

<pallas_src>
import functools
import math

import jax
import jax.numpy as jnp
from jax.experimental import pallas as pl
from jax.experimental.pallas import tpu as pltpu


# ----------------------------- tiling helpers ------------------------------

def _tile(dim, target, quantum):
    """Pick a tile size and a (possibly padded) dimension.

    Returns (tile, padded_dim): tile <= target, tile a multiple of `quantum`
    (or the full dim when dim <= target), and padded_dim % tile == 0.
    """
    if dim <= target:
        return dim, dim
    t = (target // quantum) * quantum
    tt = t
    while tt >= quantum:
        if dim % tt == 0:
            return tt, dim
        tt -= quantum
    padded = ((dim + t - 1) // t) * t
    return t, padded


def _apply_act(y, act):
    if act == "gelu":
        # TODO(synk): PyTorch BERT uses erf-GELU; tanh approximation kept here
        # (~1e-3 close) to guarantee clean Mosaic lowering.
        return 0.5 * y * (1.0 + jnp.tanh(0.7978845608028654 *
                                         (y + 0.044715 * y * y * y)))
    if act == "tanh":
        return jnp.tanh(y)
    return y


# ------------------------- tiled linear (matmul) ----------------------------

def _linear_kernel(x_ref, w_ref, b_ref, o_ref, acc_ref, *, act):
    k = pl.program_id(2)

    @pl.when(k == 0)
    def _init():
        acc_ref[...] = jnp.zeros_like(acc_ref)

    acc_ref[...] += jnp.dot(x_ref[...], w_ref[...],          # bf16 x bf16 -> MXU
                            preferred_element_type=jnp.float32)

    @pl.when(k == pl.num_programs(2) - 1)
    def _finalize():
        y = acc_ref[...] + b_ref[...]                        # f32 epilogue
        o_ref[...] = _apply_act(y, act).astype(o_ref.dtype)


def linear(x, w, b, act="none", out_dtype=jnp.bfloat16, *,
           tm=256, tn=512, tk=512):
    """x: [M, K] bf16, w: [K, N] bf16, b: [N] f32 -> [M, N] out_dtype."""
    M, K = x.shape
    N = w.shape[1]
    tm, Mp = _tile(M, tm, 8)
    tn, Np = _tile(N, tn, 256)
    tk, Kp = _tile(K, tk, 256)
    if (Mp, Kp) != (M, K):
        x = jnp.pad(x, ((0, Mp - M), (0, Kp - K)))
    if (Kp, Np) != (K, N):
        w = jnp.pad(w, ((0, Kp - K), (0, Np - N)))
    b2 = b.reshape(1, N).astype(jnp.float32)
    if Np != N:
        b2 = jnp.pad(b2, ((0, 0), (0, Np - N)))

    out = pl.pallas_call(
        functools.partial(_linear_kernel, act=act),
        out_shape=jax.ShapeDtypeStruct((Mp, Np), out_dtype),
        grid=(Mp // tm, Np // tn, Kp // tk),
        in_specs=[
            pl.BlockSpec((tm, tk), lambda i, j, k: (i, k)),
            pl.BlockSpec((tk, tn), lambda i, j, k: (k, j)),
            pl.BlockSpec((1, tn), lambda i, j, k: (0, j)),
        ],
        out_specs=pl.BlockSpec((tm, tn), lambda i, j, k: (i, j)),
        scratch_shapes=[pltpu.VMEM((tm, tn), jnp.float32)],
        compiler_params=pltpu.CompilerParams(
            dimension_semantics=("parallel", "parallel", "arbitrary")),
    )(x, w, b2)
    if (Mp, Np) != (M, N):
        out = out[:M, :N]
    return out


# ------------- tiled linear fused with residual-add + LayerNorm -------------

def _linear_res_ln_kernel(x_ref, w_ref, b_ref, r_ref, g_ref, bb_ref,
                          o_ref, acc_ref):
    k = pl.program_id(1)

    @pl.when(k == 0)
    def _init():
        acc_ref[...] = jnp.zeros_like(acc_ref)

    acc_ref[...] += jnp.dot(x_ref[...], w_ref[...],
                            preferred_element_type=jnp.float32)

    @pl.when(k == pl.num_programs(1) - 1)
    def _finalize():
        y = acc_ref[...] + b_ref[...] + r_ref[...].astype(jnp.float32)
        mean = jnp.mean(y, axis=-1, keepdims=True)
        var = jnp.mean((y - mean) * (y - mean), axis=-1, keepdims=True)
        xhat = (y - mean) * jax.lax.rsqrt(var + 1e-12)       # eps matches BERT
        o_ref[...] = (xhat * g_ref[...] + bb_ref[...]).astype(o_ref.dtype)


def linear_residual_ln(x, w, b, residual, gamma, beta,
                       out_dtype=jnp.bfloat16, *, tm=256, tk=512):
    """LayerNorm(x @ w + b + residual); N (= hidden) kept whole for the
    row-wise mean/var in the epilogue, M and K tiled (and padded if needed)."""
    M, K = x.shape
    N = w.shape[1]
    tm, Mp = _tile(M, tm, 8)
    tk, Kp = _tile(K, tk, 256)
    if (Mp, Kp) != (M, K):
        x = jnp.pad(x, ((0, Mp - M), (0, Kp - K)))
    if Kp != K:
        w = jnp.pad(w, ((0, Kp - K), (0, 0)))
    if Mp != M:
        residual = jnp.pad(residual, ((0, Mp - M), (0, 0)))

    out = pl.pallas_call(
        _linear_res_ln_kernel,
        out_shape=jax.ShapeDtypeStruct((Mp, N), out_dtype),
        grid=(Mp // tm, Kp // tk),
        in_specs=[
            pl.BlockSpec((tm, tk), lambda i, k: (i, k)),
            pl.BlockSpec((tk, N), lambda i, k: (k, 0)),
            pl.BlockSpec((1, N), lambda i, k: (0, 0)),
            pl.BlockSpec((tm, N), lambda i, k: (i, 0)),
            pl.BlockSpec((1, N), lambda i, k: (0, 0)),
            pl.BlockSpec((1, N), lambda i, k: (0, 0)),
        ],
        out_specs=pl.BlockSpec((tm, N), lambda i, k: (i, 0)),
        scratch_shapes=[pltpu.VMEM((tm, N), jnp.float32)],
        compiler_params=pltpu.CompilerParams(
            dimension_semantics=("parallel", "arbitrary")),
    )(x, w, b.reshape(1, N).astype(jnp.float32), residual,
      gamma.reshape(1, N), beta.reshape(1, N))
    if Mp != M:
        out = out[:M]
    return out


# ------------------------- standalone LayerNorm -----------------------------
# (only for the embedding LayerNorm, which has no matmul to fuse into)

def _layernorm_kernel(x_ref, g_ref, b_ref, o_ref):
    x = x_ref[...].astype(jnp.float32)
    mean = jnp.mean(x, axis=-1, keepdims=True)
    var = jnp.mean((x - mean) * (x - mean), axis=-1, keepdims=True)
    xhat = (x - mean) * jax.lax.rsqrt(var + 1e-12)
    o_ref[...] = (xhat * g_ref[...] + b_ref[...]).astype(o_ref.dtype)


def layernorm(x, gamma, beta, out_dtype=jnp.bfloat16, *, tm=512):
    M, H = x.shape
    tm, Mp = _tile(M, tm, 8)
    if Mp != M:
        x = jnp.pad(x, ((0, Mp - M), (0, 0)))
    out = pl.pallas_call(
        _layernorm_kernel,
        out_shape=jax.ShapeDtypeStruct((Mp, H), out_dtype),
        grid=(Mp // tm,),
        in_specs=[
            pl.BlockSpec((tm, H), lambda i: (i, 0)),
            pl.BlockSpec((1, H), lambda i: (0, 0)),
            pl.BlockSpec((1, H), lambda i: (0, 0)),
        ],
        out_specs=pl.BlockSpec((tm, H), lambda i: (i, 0)),
        compiler_params=pltpu.CompilerParams(dimension_semantics=("parallel",)),
    )(x, gamma.reshape(1, H), beta.reshape(1, H))
    if Mp != M:
        out = out[:M]
    return out


# --------------------------- multi-head attention ---------------------------

def _attention_kernel(qkv_ref, m_ref, o_ref, *, nh, dh):
    """qkv block: [1, S, 3H] bf16 (heads split in VMEM); mask: [1, 1, S] f32;
    output block: [1, S, H]. The 1/sqrt(dh) scale is already folded into the
    Q columns of wqkv, so no per-element scaling happens here."""
    H = nh * dh
    qkv = qkv_ref[0]                               # [S, 3H] bf16, single load
    mask = m_ref[0]                                # [1, S] f32 additive
    for h in range(nh):                            # static unroll over heads
        q = qkv[:, h * dh:(h + 1) * dh]            # [S, dh]
        k = qkv[:, H + h * dh:H + (h + 1) * dh]    # [S, dh]
        v = qkv[:, 2 * H + h * dh:2 * H + (h + 1) * dh]
        # q @ k^T without materializing a transpose.
        s = jax.lax.dot_general(q, k, (((1,), (1,)), ((), ())),
                                preferred_element_type=jnp.float32)  # [S, S]
        s = s + mask                               # broadcast over query rows
        s = s - jnp.max(s, axis=-1, keepdims=True)
        p = jnp.exp(s)
        p = p * pl.reciprocal(jnp.sum(p, axis=-1, keepdims=True), approx=True)
        ctx = jnp.dot(p.astype(v.dtype), v,
                      preferred_element_type=jnp.float32)            # [S, dh]
        o_ref[0, :, h * dh:(h + 1) * dh] = ctx.astype(o_ref.dtype)


def attention(qkv, add_mask, *, nh, dh, out_dtype=jnp.bfloat16):
    """qkv: [B, S, 3H] bf16 (fused Q|K|V), add_mask: [B, 1, S] f32.
    Returns [B, S, H]. One batch element per grid step; per-head working set
    (bf16 q/k/v + one f32 [S, S] score) stays well under the 16 MiB v5e
    scoped-VMEM default even at S=512, H=768."""
    B, S, threeH = qkv.shape
    H = nh * dh
    return pl.pallas_call(
        functools.partial(_attention_kernel, nh=nh, dh=dh),
        out_shape=jax.ShapeDtypeStruct((B, S, H), out_dtype),
        grid=(B,),
        in_specs=[
            pl.BlockSpec((1, S, threeH), lambda b: (b, 0, 0)),
            pl.BlockSpec((1, 1, S), lambda b: (b, 0, 0)),
        ],
        out_specs=pl.BlockSpec((1, S, H), lambda b: (b, 0, 0)),
        compiler_params=pltpu.CompilerParams(dimension_semantics=("parallel",)),
    )(qkv, add_mask)


# ---------------------- fused pooler (tanh) + classifier ---------------------

def _pooler_classifier_kernel(cls_ref, wp_ref, bp_ref, wf_ref, bf_ref, o_ref):
    pooled = jnp.tanh(
        jnp.dot(cls_ref[...], wp_ref[...], preferred_element_type=jnp.float32)
        + bp_ref[...])
    # dropout(p=cfg.dropout): identity at inference (deterministic)
    logits = jnp.dot(pooled.astype(wf_ref.dtype), wf_ref[...],
                     preferred_element_type=jnp.float32) + bf_ref[...]
    o_ref[...] = logits.astype(o_ref.dtype)


def pooler_classifier(cls, wp, bp, wf, bf):
    """cls: [B, H] bf16; wf already lane-padded to a multiple of 128.
    Tiny (M = B) kernel -> one fused call instead of two launches."""
    B, H = cls.shape
    Np = wf.shape[1]
    return pl.pallas_call(
        _pooler_classifier_kernel,
        out_shape=jax.ShapeDtypeStruct((B, Np), jnp.float32),
        grid=(1,),
        in_specs=[
            pl.BlockSpec((B, H), lambda i: (0, 0)),
            pl.BlockSpec((H, H), lambda i: (0, 0)),
            pl.BlockSpec((1, H), lambda i: (0, 0)),
            pl.BlockSpec((H, Np), lambda i: (0, 0)),
            pl.BlockSpec((1, Np), lambda i: (0, 0)),
        ],
        out_specs=pl.BlockSpec((B, Np), lambda i: (0, 0)),
        compiler_params=pltpu.CompilerParams(dimension_semantics=("arbitrary",)),
    )(cls, wp, bp.reshape(1, H).astype(jnp.float32),
      wf, bf.reshape(1, Np).astype(jnp.float32))


# ------------------------------ model config -------------------------------

class Config:
    vocab_size = 128
    hidden_size = 32
    num_layers = 2
    num_heads = 2
    intermediate_size = 64
    max_position = 32
    type_vocab_size = 2
    class_num = 5
    dropout = 0.1  # inference -> identity


def init_params(cfg, key):
    def nrm(k, shape):
        return jax.random.normal(k, shape, jnp.float32) * 0.02

    keys = iter(jax.random.split(key, 64))
    H, I = cfg.hidden_size, cfg.intermediate_size
    dh = H // cfg.num_heads
    scale = 1.0 / math.sqrt(dh)
    bf = jnp.bfloat16
    p = {
        "word_emb": nrm(next(keys), (cfg.vocab_size, H)),
        "pos_emb": nrm(next(keys), (cfg.max_position, H)),
        "type_emb": nrm(next(keys), (cfg.type_vocab_size, H)),
        "emb_ln_g": jnp.ones((H,), jnp.float32),
        "emb_ln_b": jnp.zeros((H,), jnp.float32),
        "layers": [],
        "pooler_w": nrm(next(keys), (H, H)).astype(bf),
        "pooler_b": jnp.zeros((H,), jnp.float32),
        "fc_w": nrm(next(keys), (H, cfg.class_num)).astype(bf),
        "fc_b": jnp.zeros((cfg.class_num,), jnp.float32),
    }
    for _ in range(cfg.num_layers):
        # fold the 1/sqrt(head_dim) softmax scale into the Q projection
        # (when loading pretrained weights, also scale the Q bias).
        wq = nrm(next(keys), (H, H)) * scale
        wk = nrm(next(keys), (H, H))
        wv = nrm(next(keys), (H, H))
        layer = {
            "wqkv": jnp.concatenate([wq, wk, wv], axis=1).astype(bf),
            "bqkv": jnp.zeros((3 * H,), jnp.float32),
            "wo": nrm(next(keys), (H, H)).astype(bf),
            "bo": jnp.zeros((H,), jnp.float32),
            "attn_ln_g": jnp.ones((H,), jnp.float32),
            "attn_ln_b": jnp.zeros((H,), jnp.float32),
            "wi": nrm(next(keys), (H, I)).astype(bf),
            "bi": jnp.zeros((I,), jnp.float32),
            "wo2": nrm(next(keys), (I, H)).astype(bf),
            "bo2": jnp.zeros((H,), jnp.float32),
            "out_ln_g": jnp.ones((H,), jnp.float32),
            "out_ln_b": jnp.zeros((H,), jnp.float32),
        }
        p["layers"].append(layer)
    return p


# ------------------------------ forward pass --------------------------------

def bert_forward(cfg, params, input_ids, token_type_ids, attention_mask):
    B, S = input_ids.shape
    H = cfg.hidden_size
    nh = cfg.num_heads
    dh = H // nh

    # --- embeddings (gathers are XLA glue, LayerNorm is a kernel) ---
    positions = jnp.arange(S, dtype=jnp.int32)
    emb = (jnp.take(params["word_emb"], input_ids, axis=0)
           + jnp.take(params["type_emb"], token_type_ids, axis=0)
           + jnp.take(params["pos_emb"], positions, axis=0)[None, :, :])
    x = layernorm(emb.reshape(B * S, H).astype(jnp.bfloat16),
                  params["emb_ln_g"], params["emb_ln_b"])
    # TODO(synk): embedding dropout omitted (inference / eval -> identity)

    # --- additive attention mask, compact [B, 1, S]; broadcast in-kernel ---
    add_mask = ((1.0 - attention_mask.astype(jnp.float32)) * -10000.0
                ).reshape(B, 1, S)

    for layer in params["layers"]:
        # fused QKV projection: one [H, 3H] bf16 matmul per layer
        qkv = linear(x, layer["wqkv"], layer["bqkv"])            # [B*S, 3H]
        # attention consumes QKV directly and emits [B, S, H]; the reshape
        # below is free (no HBM transpose traffic).
        ctx = attention(qkv.reshape(B, S, 3 * H), add_mask,
                        nh=nh, dh=dh).reshape(B * S, H)
        # attention output projection fused with residual + LayerNorm
        x = linear_residual_ln(ctx, layer["wo"], layer["bo"],
                               x, layer["attn_ln_g"], layer["attn_ln_b"])
        # FFN: up-proj + GELU (bf16 intermediate), down-proj fused with
        # residual + LayerNorm
        inter = linear(x, layer["wi"], layer["bi"], act="gelu")
        x = linear_residual_ln(inter, layer["wo2"], layer["bo2"],
                               x, layer["out_ln_g"], layer["out_ln_b"])

    # --- pooler (tanh on CLS) + classifier, fused into one tiny kernel ---
    cls = x.reshape(B, S, H)[:, 0, :]                            # [B, H] bf16
    N = cfg.class_num
    Np = ((N + 127) // 128) * 128                                # lane-dense
    fc_w = jnp.pad(params["fc_w"], ((0, 0), (0, Np - N)))
    fc_b = jnp.pad(params["fc_b"], (0, Np - N))
    logits = pooler_classifier(cls, params["pooler_w"], params["pooler_b"],
                               fc_w, fc_b)[:, :N]                # [B, class_num]
    return logits


# ---------------------------------- main ------------------------------------

if __name__ == "__main__":
    cfg = Config()
    key = jax.random.PRNGKey(0)
    pkey, ikey, tkey = jax.random.split(key, 3)

    params = init_params(cfg, pkey)

    B, S = 2, 8
    input_ids = jax.random.randint(ikey, (B, S), 0, cfg.vocab_size,
                                   dtype=jnp.int32)
    token_type_ids = jax.random.randint(tkey, (B, S), 0, cfg.type_vocab_size,
                                        dtype=jnp.int32)
    # mask out the last two tokens of the second example
    attention_mask = jnp.ones((B, S), jnp.int32).at[1, -2:].set(0)

    fwd = jax.jit(functools.partial(bert_forward, cfg, params))
    logits = fwd(input_ids, token_type_ids, attention_mask)
    jax.block_until_ready(logits)
    assert logits.shape == (B, cfg.class_num)
    assert bool(jnp.all(jnp.isfinite(logits)))
    print("KERNEL_OK")
</pallas_src>

<mosaic_0001>
module attributes {stable_mosaic.version = 11 : i64} {
  func.func @_layernorm_kernel(%arg0: i32, %arg1: memref<16x32xbf16, #tpu.memory_space<vmem>>, %arg2: memref<1x32xf32, #tpu.memory_space<vmem>>, %arg3: memref<1x32xf32, #tpu.memory_space<vmem>>, %arg4: memref<16x32xbf16, #tpu.memory_space<vmem>>) attributes {dimension_semantics = [#tpu.dimension_semantics<parallel>], iteration_bounds = array<i64: 1>, scalar_prefetch = 0 : i64, scratch_operands = 0 : i64, tpu.core_type = #tpu.core_type<tc>, window_params = [{transform_indices = @transform_0, window_bounds = array<i64: 16, 32>}, {pipeline_mode = #tpu.pipeline_mode<synchronous>, transform_indices = @transform_1, window_bounds = array<i64: 1, 32>}, {pipeline_mode = #tpu.pipeline_mode<synchronous>, transform_indices = @transform_2, window_bounds = array<i64: 1, 32>}, {transform_indices = @transform_3, window_bounds = array<i64: 16, 32>}]} {
    %c0 = arith.constant 0 : index
    %c0_0 = arith.constant 0 : index
    %0 = vector.load %arg1[%c0, %c0_0] : memref<16x32xbf16, #tpu.memory_space<vmem>>, vector<16x32xbf16>
    %1 = arith.extf %0 : vector<16x32xbf16> to vector<16x32xf32>
    %cst = arith.constant dense<0.000000e+00> : vector<16xf32>
    %2 = vector.multi_reduction <add>, %1, %cst [1] : vector<16x32xf32> to vector<16xf32>
    %3 = vector.shape_cast %2 : vector<16xf32> to vector<16x1xf32>
    %cst_1 = arith.constant 3.200000e+01 : f32
    %4 = vector.broadcast %cst_1 : f32 to vector<16x1xf32>
    %5 = arith.divf %3, %4 : vector<16x1xf32>
    %6 = vector.broadcast %5 : vector<16x1xf32> to vector<16x32xf32>
    %7 = arith.subf %1, %6 : vector<16x32xf32>
    %8 = vector.broadcast %5 : vector<16x1xf32> to vector<16x32xf32>
    %9 = arith.subf %1, %8 : vector<16x32xf32>
    %10 = arith.mulf %7, %9 : vector<16x32xf32>
    %cst_2 = arith.constant dense<0.000000e+00> : vector<16xf32>
    %11 = vector.multi_reduction <add>, %10, %cst_2 [1] : vector<16x32xf32> to vector<16xf32>
    %12 = vector.shape_cast %11 : vector<16xf32> to vector<16x1xf32>
    %cst_3 = arith.constant 3.200000e+01 : f32
    %13 = vector.broadcast %cst_3 : f32 to vector<16x1xf32>
    %14 = arith.divf %12, %13 : vector<16x1xf32>
    %15 = vector.broadcast %5 : vector<16x1xf32> to vector<16x32xf32>
    %16 = arith.subf %1, %15 : vector<16x32xf32>
    %cst_4 = arith.constant 9.99999996E-13 : f32
    %17 = vector.broadcast %cst_4 : f32 to vector<16x1xf32>
    %18 = arith.addf %14, %17 : vector<16x1xf32>
    %19 = math.rsqrt %18 : vector<16x1xf32>
    %20 = vector.broadcast %19 : vector<16x1xf32> to vector<16x32xf32>
    %21 = arith.mulf %16, %20 : vector<16x32xf32>
    %c0_5 = arith.constant 0 : index
    %c0_6 = arith.constant 0 : index
    %22 = vector.load %arg2[%c0_5, %c0_6] : memref<1x32xf32, #tpu.memory_space<vmem>>, vector<1x32xf32>
    %23 = vector.broadcast %22 : vector<1x32xf32> to vector<16x32xf32>
    %24 = arith.mulf %21, %23 : vector<16x32xf32>
    %c0_7 = arith.constant 0 : index
    %c0_8 = arith.constant 0 : index
    %25 = vector.load %arg3[%c0_7, %c0_8] : memref<1x32xf32, #tpu.memory_space<vmem>>, vector<1x32xf32>
    %26 = vector.broadcast %25 : vector<1x32xf32> to vector<16x32xf32>
    %27 = arith.addf %24, %26 : vector<16x32xf32>
    %28 = arith.truncf %27 : vector<16x32xf32> to vector<16x32xbf16>
    %c0_9 = arith.constant 0 : index
    %c0_10 = arith.constant 0 : index
    %29 = vector.load %arg4[%c0_9, %c0_10] : memref<16x32xbf16, #tpu.memory_space<vmem>>, vector<16x32xbf16>
    tpu.vector_store %arg4[%c0_9, %c0_10], %28 {strides = array<i32>} : memref<16x32xbf16, #tpu.memory_space<vmem>>, vector<16x32xbf16>,
    return
  }
  func.func @transform_0(%arg0: i32) -> (i32, i32) {
    %c0_i32 = arith.constant 0 : i32
    %c0_i32_0 = arith.constant 0 : i32
    return %arg0, %c0_i32 : i32, i32
  }
  func.func @transform_1(%arg0: i32) -> (i32, i32) {
    %c0_i32 = arith.constant 0 : i32
    %c0_i32_0 = arith.constant 0 : i32
    %c0_i32_1 = arith.constant 0 : i32
    return %c0_i32, %c0_i32_0 : i32, i32
  }
  func.func @transform_2(%arg0: i32) -> (i32, i32) {
    %c0_i32 = arith.constant 0 : i32
    %c0_i32_0 = arith.constant 0 : i32
    %c0_i32_1 = arith.constant 0 : i32
    return %c0_i32, %c0_i32_0 : i32, i32
  }
  func.func @transform_3(%arg0: i32) -> (i32, i32) {
    %c0_i32 = arith.constant 0 : i32
    %c0_i32_0 = arith.constant 0 : i32
    return %arg0, %c0_i32 : i32, i32
  }
}

module attributes {stable_mosaic.version = 11 : i64} {
  func.func @_linear_kernel(%arg0: i32, %arg1: i32, %arg2: i32, %arg3: memref<16x32xbf16, #tpu.memory_space<vmem>>, %arg4: memref<32x96xbf16, #tpu.memory_space<vmem>>, %arg5: memref<1x96xf32, #tpu.memory_space<vmem>>, %arg6: memref<16x96xbf16, #tpu.memory_space<vmem>>, %arg7: memref<16x96xf32, #tpu.memory_space<vmem>>) attributes {dimension_semantics = [#tpu.dimension_semantics<parallel>, #tpu.dimension_semantics<parallel>, #tpu.dimension_semantics<arbitrary>], iteration_bounds = array<i64: 1, 1, 1>, scalar_prefetch = 0 : i64, scratch_operands = 1 : i64, tpu.core_type = #tpu.core_type<tc>, window_params = [{transform_indices = @transform_0, window_bounds = array<i64: 16, 32>}, {transform_indices = @transform_1, window_bounds = array<i64: 32, 96>}, {transform_indices = @transform_2, window_bounds = array<i64: 1, 96>}, {transform_indices = @transform_3, window_bounds = array<i64: 16, 96>}]} {
    %c0_i32 = arith.constant 0 : i32
    %0 = arith.cmpi eq, %arg2, %c0_i32 : i32
    %1 = arith.extui %0 : i1 to i32
    %c0_i32_0 = arith.constant 0 : i32
    %2 = arith.cmpi ne, %1, %c0_i32_0 : i32
    scf.if %2 {
      %cst_10 = arith.constant 0.000000e+00 : f32
      %12 = vector.broadcast %cst_10 : f32 to vector<16x96xf32>
      %c0_11 = arith.constant 0 : index
      %c0_12 = arith.constant 0 : index
      %13 = vector.load %arg7[%c0_11, %c0_12] : memref<16x96xf32, #tpu.memory_space<vmem>>, vector<16x96xf32>
      tpu.vector_store %arg7[%c0_11, %c0_12], %12 {strides = array<i32>} : memref<16x96xf32, #tpu.memory_space<vmem>>, vector<16x96xf32>,
    } else {
    }
    %c0 = arith.constant 0 : index
    %c0_1 = arith.constant 0 : index
    %3 = vector.load %arg7[%c0, %c0_1] : memref<16x96xf32, #tpu.memory_space<vmem>>, vector<16x96xf32>
    %c0_2 = arith.constant 0 : index
    %c0_3 = arith.constant 0 : index
    %4 = vector.load %arg3[%c0_2, %c0_3] : memref<16x32xbf16, #tpu.memory_space<vmem>>, vector<16x32xbf16>
    %c0_4 = arith.constant 0 : index
    %c0_5 = arith.constant 0 : index
    %5 = vector.load %arg4[%c0_4, %c0_5] : memref<32x96xbf16, #tpu.memory_space<vmem>>, vector<32x96xbf16>
    %cst = arith.constant dense<0.000000e+00> : vector<16x96xf32>
    %6 = tpu.matmul %4, %5, %cst {dimension_numbers = #tpu.dot_dimension_numbers<[1], [0], [0], [1], [0, 0, 1, 1], [], []>} : vector<16x32xbf16>, vector<32x96xbf16>, vector<16x96xf32> -> vector<16x96xf32>
    %7 = arith.addf %3, %6 : vector<16x96xf32>
    %c0_6 = arith.constant 0 : index
    %c0_7 = arith.constant 0 : index
    %8 = vector.load %arg7[%c0_6, %c0_7] : memref<16x96xf32, #tpu.memory_space<vmem>>, vector<16x96xf32>
    tpu.vector_store %arg7[%c0_6, %c0_7], %7 {strides = array<i32>} : memref<16x96xf32, #tpu.memory_space<vmem>>, vector<16x96xf32>,
    %c0_i32_8 = arith.constant 0 : i32
    %9 = arith.cmpi eq, %arg2, %c0_i32_8 : i32
    %10 = arith.extui %9 : i1 to i32
    %c0_i32_9 = arith.constant 0 : i32
    %11 = arith.cmpi ne, %10, %c0_i32_9 : i32
    scf.if %11 {
      %c0_10 = arith.constant 0 : index
      %c0_11 = arith.constant 0 : index
      %12 = vector.load %arg7[%c0_10, %c0_11] : memref<16x96xf32, #tpu.memory_space<vmem>>, vector<16x96xf32>
      %c0_12 = arith.constant 0 : index
      %c0_13 = arith.constant 0 : index
      %13 = vector.load %arg5[%c0_12, %c0_13] : memref<1x96xf32, #tpu.memory_space<vmem>>, vector<1x96xf32>
      %14 = vector.broadcast %13 : vector<1x96xf32> to vector<16x96xf32>
      %15 = arith.addf %12, %14 : vector<16x96xf32>
      %16 = arith.truncf %15 : vector<16x96xf32> to vector<16x96xbf16>
      %c0_14 = arith.constant 0 : index
      %c0_15 = arith.constant 0 : index
      %17 = vector.load %arg6[%c0_14, %c0_15] : memref<16x96xbf16, #tpu.memory_space<vmem>>, vector<16x96xbf16>
      tpu.vector_store %arg6[%c0_14, %c0_15], %16 {strides = array<i32>} : memref<16x96xbf16, #tpu.memory_space<vmem>>, vector<16x96xbf16>,
    } else {
    }
    return
  }
  func.func @transform_0(%arg0: i32, %arg1: i32, %arg2: i32) -> (i32, i32) {
    %c0_i32 = arith.constant 0 : i32
    return %arg0, %arg2 : i32, i32
  }
  func.func @transform_1(%arg0: i32, %arg1: i32, %arg2: i32) -> (i32, i32) {
    %c0_i32 = arith.constant 0 : i32
    return %arg2, %arg1 : i32, i32
  }
  func.func @transform_2(%arg0: i32, %arg1: i32, %arg2: i32) -> (i32, i32) {
    %c0_i32 = arith.constant 0 : i32
    %c0_i32_0 = arith.constant 0 : i32
    return %c0_i32, %arg1 : i32, i32
  }
  func.func @transform_3(%arg0: i32, %arg1: i32, %arg2: i32) -> (i32, i32) {
    %c0_i32 = arith.constant 0 : i32
    return %arg0, %arg1 : i32, i32
  }
}

module attributes {stable_mosaic.version = 11 : i64} {
  func.func @_attention_kernel(%arg0: i32, %arg1: memref<1x8x96xbf16, #tpu.memory_space<vmem>>, %arg2: memref<1x1x8xf32, #tpu.memory_space<vmem>>, %arg3: memref<1x8x32xbf16, #tpu.memory_space<vmem>>) attributes {dimension_semantics = [#tpu.dimension_semantics<parallel>], iteration_bounds = array<i64: 2>, scalar_prefetch = 0 : i64, scratch_operands = 0 : i64, tpu.core_type = #tpu.core_type<tc>, window_params = [{transform_indices = @transform_0, window_bounds = array<i64: 1, 8, 96>}, {transform_indices = @transform_1, window_bounds = array<i64: 1, 1, 8>}, {transform_indices = @transform_2, window_bounds = array<i64: 1, 8, 32>}]} {
    %c0 = arith.constant 0 : index
    %c0_0 = arith.constant 0 : index
    %c0_1 = arith.constant 0 : index
    %0 = vector.load %arg1[%c0, %c0_0, %c0_1] : memref<1x8x96xbf16, #tpu.memory_space<vmem>>, vector<1x8x96xbf16>
    %1 = vector.shape_cast %0 : vector<1x8x96xbf16> to vector<8x96xbf16>
    %c0_2 = arith.constant 0 : index
    %c0_3 = arith.constant 0 : index
    %c0_4 = arith.constant 0 : index
    %2 = vector.load %arg2[%c0_2, %c0_3, %c0_4] : memref<1x1x8xf32, #tpu.memory_space<vmem>>, vector<1x1x8xf32>
    %3 = vector.shape_cast %2 : vector<1x1x8xf32> to vector<1x8xf32>
    %4 = vector.extract_strided_slice %1 {offsets = [0, 0], sizes = [8, 16], strides = [1, 1]} : vector<8x96xbf16> to vector<8x16xbf16>
    %5 = vector.extract_strided_slice %1 {offsets = [0, 32], sizes = [8, 16], strides = [1, 1]} : vector<8x96xbf16> to vector<8x16xbf16>
    %6 = vector.extract_strided_slice %1 {offsets = [0, 64], sizes = [8, 16], strides = [1, 1]} : vector<8x96xbf16> to vector<8x16xbf16>
    %cst = arith.constant dense<0.000000e+00> : vector<8x8xf32>
    %7 = tpu.matmul %4, %5, %cst {dimension_numbers = #tpu.dot_dimension_numbers<[1], [1], [0], [0], [0, 0, 1, 0], [], []>} : vector<8x16xbf16>, vector<8x16xbf16>, vector<8x8xf32> -> vector<8x8xf32>
    %8 = vector.broadcast %3 : vector<1x8xf32> to vector<8x8xf32>
    %9 = arith.addf %7, %8 : vector<8x8xf32>
    %cst_5 = arith.constant dense<0xFF800000> : vector<8xf32>
    %10 = vector.multi_reduction <maximumf>, %9, %cst_5 [1] : vector<8x8xf32> to vector<8xf32>
    %11 = vector.shape_cast %10 : vector<8xf32> to vector<8x1xf32>
    %12 = vector.broadcast %11 : vector<8x1xf32> to vector<8x8xf32>
    %13 = arith.subf %9, %12 : vector<8x8xf32>
    %14 = math.exp %13 : vector<8x8xf32>
    %cst_6 = arith.constant dense<0.000000e+00> : vector<8xf32>
    %15 = vector.multi_reduction <add>, %14, %cst_6 [1] : vector<8x8xf32> to vector<8xf32>
    %16 = vector.shape_cast %15 : vector<8xf32> to vector<8x1xf32>
    %17 = tpu.reciprocal %16 {approx = true} : vector<8x1xf32> -> vector<8x1xf32>
    %18 = vector.broadcast %17 : vector<8x1xf32> to vector<8x8xf32>
    %19 = arith.mulf %14, %18 : vector<8x8xf32>
    %20 = arith.truncf %19 : vector<8x8xf32> to vector<8x8xbf16>
    %cst_7 = arith.constant dense<0.000000e+00> : vector<8x16xf32>
    %21 = tpu.matmul %20, %6, %cst_7 {dimension_numbers = #tpu.dot_dimension_numbers<[1], [0], [0], [1], [0, 0, 1, 1], [], []>} : vector<8x8xbf16>, vector<8x16xbf16>, vector<8x16xf32> -> vector<8x16xf32>
    %22 = arith.truncf %21 : vector<8x16xf32> to vector<8x16xbf16>
    %c0_8 = arith.constant 0 : index
    %c0_9 = arith.constant 0 : index
    %c0_10 = arith.constant 0 : index
    %23 = vector.load %arg3[%c0_8, %c0_9, %c0_10] : memref<1x8x32xbf16, #tpu.memory_space<vmem>>, vector<1x8x16xbf16>
    %24 = vector.shape_cast %23 : vector<1x8x16xbf16> to vector<8x16xbf16>
    %25 = vector.shape_cast %22 : vector<8x16xbf16> to vector<1x8x16xbf16>
    tpu.vector_store %arg3[%c0_8, %c0_9, %c0_10], %25 {strides = array<i32>} : memref<1x8x32xbf16, #tpu.memory_space<vmem>>, vector<1x8x16xbf16>,
    %26 = vector.extract_strided_slice %1 {offsets = [0, 16], sizes = [8, 16], strides = [1, 1]} : vector<8x96xbf16> to vector<8x16xbf16>
    %27 = vector.extract_strided_slice %1 {offsets = [0, 48], sizes = [8, 16], strides = [1, 1]} : vector<8x96xbf16> to vector<8x16xbf16>
    %28 = vector.extract_strided_slice %1 {offsets = [0, 80], sizes = [8, 16], strides = [1, 1]} : vector<8x96xbf16> to vector<8x16xbf16>
    %cst_11 = arith.constant dense<0.000000e+00> : vector<8x8xf32>
    %29 = tpu.matmul %26, %27, %cst_11 {dimension_numbers = #tpu.dot_dimension_numbers<[1], [1], [0], [0], [0, 0, 1, 0], [], []>} : vector<8x16xbf16>, vector<8x16xbf16>, vector<8x8xf32> -> vector<8x8xf32>
    %30 = vector.broadcast %3 : vector<1x8xf32> to vector<8x8xf32>
    %31 = arith.addf %29, %30 : vector<8x8xf32>
    %cst_12 = arith.constant dense<0xFF800000> : vector<8xf32>
    %32 = vector.multi_reduction <maximumf>, %31, %cst_12 [1] : vector<8x8xf32> to vector<8xf32>
    %33 = vector.shape_cast %32 : vector<8xf32> to vector<8x1xf32>
    %34 = vector.broadcast %33 : vector<8x1xf32> to vector<8x8xf32>
    %35 = arith.subf %31, %34 : vector<8x8xf32>
    %36 = math.exp %35 : vector<8x8xf32>
    %cst_13 = arith.constant dense<0.000000e+00> : vector<8xf32>
    %37 = vector.multi_reduction <add>, %36, %cst_13 [1] : vector<8x8xf32> to vector<8xf32>
    %38 = vector.shape_cast %37 : vector<8xf32> to vector<8x1xf32>
    %39 = tpu.reciprocal %38 {approx = true} : vector<8x1xf32> -> vector<8x1xf32>
    %40 = vector.broadcast %39 : vector<8x1xf32> to vector<8x8xf32>
    %41 = arith.mulf %36, %40 : vector<8x8xf32>
    %42 = arith.truncf %41 : vector<8x8xf32> to vector<8x8xbf16>
    %cst_14 = arith.constant dense<0.000000e+00> : vector<8x16xf32>
    %43 = tpu.matmul %42, %28, %cst_14 {dimension_numbers = #tpu.dot_dimension_numbers<[1], [0], [0], [1], [0, 0, 1, 1], [], []>} : vector<8x8xbf16>, vector<8x16xbf16>, vector<8x16xf32> -> vector<8x16xf32>
    %44 = arith.truncf %43 : vector<8x16xf32> to vector<8x16xbf16>
    %c0_15 = arith.constant 0 : index
    %c0_16 = arith.constant 0 : index
    %c16 = arith.constant 16 : index
    %45 = vector.load %arg3[%c0_15, %c0_16, %c16] : memref<1x8x32xbf16, #tpu.memory_space<vmem>>, vector<1x8x16xbf16>
    %46 = vector.shape_cast %45 : vector<1x8x16xbf16> to vector<8x16xbf16>
    %47 = vector.shape_cast %44 : vector<8x16xbf16> to vector<1x8x16xbf16>
    tpu.vector_store %arg3[%c0_15, %c0_16, %c16], %47 {strides = array<i32>} : memref<1x8x32xbf16, #tpu.memory_space<vmem>>, vector<1x8x16xbf16>,
    return
  }
  func.func @transform_0(%arg0: i32) -> (i32, i32, i32) {
    %c0_i32 = arith.constant 0 : i32
    %c0_i32_0 = arith.constant 0 : i32
    %c0_i32_1 = arith.constant 0 : i32
    return %arg0, %c0_i32, %c0_i32_0 : i32, i32, i32
  }
  func.func @transform_1(%arg0: i32) -> (i32, i32, i32) {
    %c0_i32 = arith.constant 0 : i32
    %c0_i32_0 = arith.constant 0 : i32
    %c0_i32_1 = arith.constant 0 : i32
    return %arg0, %c0_i32, %c0_i32_0 : i32, i32, i32
  }
  func.func @transform_2(%arg0: i32) -> (i32, i32, i32) {
    %c0_i32 = arith.constant 0 : i32
    %c0_i32_0 = arith.constant 0 : i32
    %c0_i32_1 = arith.constant 0 : i32
    return %arg0, %c0_i32, %c0_i32_0 : i32, i32, i32
  }
}

module attributes {stable_mosaic.version = 11 : i64} {
  func.func @_linear_res_ln_kernel(%arg0: i32, %arg1: i32, %arg2: memref<16x32xbf16, #tpu.memory_space<vmem>>, %arg3: memref<32x32xbf16, #tpu.memory_space<vmem>>, %arg4: memref<1x32xf32, #tpu.memory_space<vmem>>, %arg5: memref<16x32xbf16, #tpu.memory_space<vmem>>, %arg6: memref<1x32xf32, #tpu.memory_space<vmem>>, %arg7: memref<1x32xf32, #tpu.memory_space<vmem>>, %arg8: memref<16x32xbf16, #tpu.memory_space<vmem>>, %arg9: memref<16x32xf32, #tpu.memory_space<vmem>>) attributes {dimension_semantics = [#tpu.dimension_semantics<parallel>, #tpu.dimension_semantics<arbitrary>], iteration_bounds = array<i64: 1, 1>, scalar_prefetch = 0 : i64, scratch_operands = 1 : i64, tpu.core_type = #tpu.core_type<tc>, window_params = [{transform_indices = @transform_0, window_bounds = array<i64: 16, 32>}, {transform_indices = @transform_1, window_bounds = array<i64: 32, 32>}, {pipeline_mode = #tpu.pipeline_mode<synchronous>, transform_indices = @transform_2, window_bounds = array<i64: 1, 32>}, {transform_indices = @transform_3, window_bounds = array<i64: 16, 32>}, {pipeline_mode = #tpu.pipeline_mode<synchronous>, transform_indices = @transform_4, window_bounds = array<i64: 1, 32>}, {pipeline_mode = #tpu.pipeline_mode<synchronous>, transform_indices = @transform_5, window_bounds = array<i64: 1, 32>}, {transform_indices = @transform_6, window_bounds = array<i64: 16, 32>}]} {
    %c0_i32 = arith.constant 0 : i32
    %0 = arith.cmpi eq, %arg1, %c0_i32 : i32
    %1 = arith.extui %0 : i1 to i32
    %c0_i32_0 = arith.constant 0 : i32
    %2 = arith.cmpi ne, %1, %c0_i32_0 : i32
    scf.if %2 {
      %cst_10 = arith.constant 0.000000e+00 : f32
      %12 = vector.broadcast %cst_10 : f32 to vector<16x32xf32>
      %c0_11 = arith.constant 0 : index
      %c0_12 = arith.constant 0 : index
      %13 = vector.load %arg9[%c0_11, %c0_12] : memref<16x32xf32, #tpu.memory_space<vmem>>, vector<16x32xf32>
      tpu.vector_store %arg9[%c0_11, %c0_12], %12 {strides = array<i32>} : memref<16x32xf32, #tpu.memory_space<vmem>>, vector<16x32xf32>,
    } else {
    }
    %c0 = arith.constant 0 : index
    %c0_1 = arith.constant 0 : index
    %3 = vector.load %arg9[%c0, %c0_1] : memref<16x32xf32, #tpu.memory_space<vmem>>, vector<16x32xf32>
    %c0_2 = arith.constant 0 : index
    %c0_3 = arith.constant 0 : index
    %4 = vector.load %arg2[%c0_2, %c0_3] : memref<16x32xbf16, #tpu.memory_space<vmem>>, vector<16x32xbf16>
    %c0_4 = arith.constant 0 : index
    %c0_5 = arith.constant 0 : index
    %5 = vector.load %arg3[%c0_4, %c0_5] : memref<32x32xbf16, #tpu.memory_space<vmem>>, vector<32x32xbf16>
    %cst = arith.constant dense<0.000000e+00> : vector<16x32xf32>
    %6 = tpu.matmul %4, %5, %cst {dimension_numbers = #tpu.dot_dimension_numbers<[1], [0], [0], [1], [0, 0, 1, 1], [], []>} : vector<16x32xbf16>, vector<32x32xbf16>, vector<16x32xf32> -> vector<16x32xf32>
    %7 = arith.addf %3, %6 : vector<16x32xf32>
    %c0_6 = arith.constant 0 : index
    %c0_7 = arith.constant 0 : index
    %8 = vector.load %arg9[%c0_6, %c0_7] : memref<16x32xf32, #tpu.memory_space<vmem>>, vector<16x32xf32>
    tpu.vector_store %arg9[%c0_6, %c0_7], %7 {strides = array<i32>} : memref<16x32xf32, #tpu.memory_space<vmem>>, vector<16x32xf32>,
    %c0_i32_8 = arith.constant 0 : i32
    %9 = arith.cmpi eq, %arg1, %c0_i32_8 : i32
    %10 = arith.extui %9 : i1 to i32
    %c0_i32_9 = arith.constant 0 : i32
    %11 = arith.cmpi ne, %10, %c0_i32_9 : i32
    scf.if %11 {
      %c0_10 = arith.constant 0 : index
      %c0_11 = arith.constant 0 : index
      %12 = vector.load %arg9[%c0_10, %c0_11] : memref<16x32xf32, #tpu.memory_space<vmem>>, vector<16x32xf32>
      %c0_12 = arith.constant 0 : index
      %c0_13 = arith.constant 0 : index
      %13 = vector.load %arg4[%c0_12, %c0_13] : memref<1x32xf32, #tpu.memory_space<vmem>>, vector<1x32xf32>
      %14 = vector.broadcast %13 : vector<1x32xf32> to vector<16x32xf32>
      %15 = arith.addf %12, %14 : vector<16x32xf32>
      %c0_14 = arith.constant 0 : index
      %c0_15 = arith.constant 0 : index
      %16 = vector.load %arg5[%c0_14, %c0_15] : memref<16x32xbf16, #tpu.memory_space<vmem>>, vector<16x32xbf16>
      %17 = arith.extf %16 : vector<16x32xbf16> to vector<16x32xf32>
      %18 = arith.addf %15, %17 : vector<16x32xf32>
      %cst_16 = arith.constant dense<0.000000e+00> : vector<16xf32>
      %19 = vector.multi_reduction <add>, %18, %cst_16 [1] : vector<16x32xf32> to vector<16xf32>
      %20 = vector.shape_cast %19 : vector<16xf32> to vector<16x1xf32>
      %cst_17 = arith.constant 3.200000e+01 : f32
      %21 = vector.broadcast %cst_17 : f32 to vector<16x1xf32>
      %22 = arith.divf %20, %21 : vector<16x1xf32>
      %23 = vector.broadcast %22 : vector<16x1xf32> to vector<16x32xf32>
      %24 = arith.subf %18, %23 : vector<16x32xf32>
      %25 = vector.broadcast %22 : vector<16x1xf32> to vector<16x32xf32>
      %26 = arith.subf %18, %25 : vector<16x32xf32>
      %27 = arith.mulf %24, %26 : vector<16x32xf32>
      %cst_18 = arith.constant dense<0.000000e+00> : vector<16xf32>
      %28 = vector.multi_reduction <add>, %27, %cst_18 [1] : vector<16x32xf32> to vector<16xf32>
      %29 = vector.shape_cast %28 : vector<16xf32> to vector<16x1xf32>
      %cst_19 = arith.constant 3.200000e+01 : f32
      %30 = vector.broadcast %cst_19 : f32 to vector<16x1xf32>
      %31 = arith.divf %29, %30 : vector<16x1xf32>
      %32 = vector.broadcast %22 : vector<16x1xf32> to vector<16x32xf32>
      %33 = arith.subf %18, %32 : vector<16x32xf32>
      %cst_20 = arith.constant 9.99999996E-13 : f32
      %34 = vector.broadcast %cst_20 : f32 to vector<16x1xf32>
      %35 = arith.addf %31, %34 : vector<16x1xf32>
      %36 = math.rsqrt %35 : vector<16x1xf32>
      %37 = vector.broadcast %36 : vector<16x1xf32> to vector<16x32xf32>
      %38 = arith.mulf %33, %37 : vector<16x32xf32>
      %c0_21 = arith.constant 0 : index
      %c0_22 = arith.constant 0 : index
      %39 = vector.load %arg6[%c0_21, %c0_22] : memref<1x32xf32, #tpu.memory_space<vmem>>, vector<1x32xf32>
      %40 = vector.broadcast %39 : vector<1x32xf32> to vector<16x32xf32>
      %41 = arith.mulf %38, %40 : vector<16x32xf32>
      %c0_23 = arith.constant 0 : index
      %c0_24 = arith.constant 0 : index
      %42 = vector.load %arg7[%c0_23, %c0_24] : memref<1x32xf32, #tpu.memory_space<vmem>>, vector<1x32xf32>
      %43 = vector.broadcast %42 : vector<1x32xf32> to vector<16x32xf32>
      %44 = arith.addf %41, %43 : vector<16x32xf32>
      %45 = arith.truncf %44 : vector<16x32xf32> to vector<16x32xbf16>
      %c0_25 = arith.constant 0 : index
      %c0_26 = arith.constant 0 : index
      %46 = vector.load %arg8[%c0_25, %c0_26] : memref<16x32xbf16, #tpu.memory_space<vmem>>, vector<16x32xbf16>
      tpu.vector_store %arg8[%c0_25, %c0_26], %45 {strides = array<i32>} : memref<16x32xbf16, #tpu.memory_space<vmem>>, vector<16x32xbf16>,
    } else {
    }
    return
  }
  func.func @transform_0(%arg0: i32, %arg1: i32) -> (i32, i32) {
    %c0_i32 = arith.constant 0 : i32
    return %arg0, %arg1 : i32, i32
  }
  func.func @transform_1(%arg0: i32, %arg1: i32) -> (i32, i32) {
    %c0_i32 = arith.constant 0 : i32
    %c0_i32_0 = arith.constant 0 : i32
    return %arg1, %c0_i32 : i32, i32
  }
  func.func @transform_2(%arg0: i32, %arg1: i32) -> (i32, i32) {
    %c0_i32 = arith.constant 0 : i32
    %c0_i32_0 = arith.constant 0 : i32
    %c0_i32_1 = arith.constant 0 : i32
    return %c0_i32, %c0_i32_0 : i32, i32
  }
  func.func @transform_3(%arg0: i32, %arg1: i32) -> (i32, i32) {
    %c0_i32 = arith.constant 0 : i32
    %c0_i32_0 = arith.constant 0 : i32
    return %arg0, %c0_i32 : i32, i32
  }
  func.func @transform_4(%arg0: i32, %arg1: i32) -> (i32, i32) {
    %c0_i32 = arith.constant 0 : i32
    %c0_i32_0 = arith.constant 0 : i32
    %c0_i32_1 = arith.constant 0 : i32
    return %c0_i32, %c0_i32_0 : i32, i32
  }
  func.func @transform_5(%arg0: i32, %arg1: i32) -> (i32, i32) {
    %c0_i32 = arith.constant 0 : i32
    %c0_i32_0 = arith.constant 0 : i32
    %c0_i32_1 = arith.constant 0 : i32
    return %c0_i32, %c0_i32_0 : i32, i32
  }
  func.func @transform_6(%arg0: i32, %arg1: i32) -> (i32, i32) {
    %c0_i32 = arith.constant 0 : i32
    %c0_i32_0 = arith.constant 0 : i32
    return %arg0, %c0_i32 : i32, i32
  }
}

module attributes {stable_mosaic.version = 11 : i64} {
  func.func @_linear_res_ln_kernel(%arg0: i32, %arg1: i32, %arg2: memref<16x64xbf16, #tpu.memory_space<vmem>>, %arg3: memref<64x32xbf16, #tpu.memory_space<vmem>>, %arg4: memref<1x32xf32, #tpu.memory_space<vmem>>, %arg5: memref<16x32xbf16, #tpu.memory_space<vmem>>, %arg6: memref<1x32xf32, #tpu.memory_space<vmem>>, %arg7: memref<1x32xf32, #tpu.memory_space<vmem>>, %arg8: memref<16x32xbf16, #tpu.memory_space<vmem>>, %arg9: memref<16x32xf32, #tpu.memory_space<vmem>>) attributes {dimension_semantics = [#tpu.dimension_semantics<parallel>, #tpu.dimension_semantics<arbitrary>], iteration_bounds = array<i64: 1, 1>, scalar_prefetch = 0 : i64, scratch_operands = 1 : i64, tpu.core_type = #tpu.core_type<tc>, window_params = [{transform_indices = @transform_0, window_bounds = array<i64: 16, 64>}, {transform_indices = @transform_1, window_bounds = array<i64: 64, 32>}, {pipeline_mode = #tpu.pipeline_mode<synchronous>, transform_indices = @transform_2, window_bounds = array<i64: 1, 32>}, {transform_indices = @transform_3, window_bounds = array<i64: 16, 32>}, {pipeline_mode = #tpu.pipeline_mode<synchronous>, transform_indices = @transform_4, window_bounds = array<i64: 1, 32>}, {pipeline_mode = #tpu.pipeline_mode<synchronous>, transform_indices = @transform_5, window_bounds = array<i64: 1, 32>}, {transform_indices = @transform_6, window_bounds = array<i64: 16, 32>}]} {
    %c0_i32 = arith.constant 0 : i32
    %0 = arith.cmpi eq, %arg1, %c0_i32 : i32
    %1 = arith.extui %0 : i1 to i32
    %c0_i32_0 = arith.constant 0 : i32
    %2 = arith.cmpi ne, %1, %c0_i32_0 : i32
    scf.if %2 {
      %cst_10 = arith.constant 0.000000e+00 : f32
      %12 = vector.broadcast %cst_10 : f32 to vector<16x32xf32>
      %c0_11 = arith.constant 0 : index
      %c0_12 = arith.constant 0 : index
      %13 = vector.load %arg9[%c0_11, %c0_12] : memref<16x32xf32, #tpu.memory_space<vmem>>, vector<16x32xf32>
      tpu.vector_store %arg9[%c0_11, %c0_12], %12 {strides = array<i32>} : memref<16x32xf32, #tpu.memory_space<vmem>>, vector<16x32xf32>,
    } else {
    }
    %c0 = arith.constant 0 : index
    %c0_1 = arith.constant 0 : index
    %3 = vector.load %arg9[%c0, %c0_1] : memref<16x32xf32, #tpu.memory_space<vmem>>, vector<16x32xf32>
    %c0_2 = arith.constant 0 : index
    %c0_3 = arith.constant 0 : index
    %4 = vector.load %arg2[%c0_2, %c0_3] : memref<16x64xbf16, #tpu.memory_space<vmem>>, vector<16x64xbf16>
    %c0_4 = arith.constant 0 : index
    %c0_5 = arith.constant 0 : index
    %5 = vector.load %arg3[%c0_4, %c0_5] : memref<64x32xbf16, #tpu.memory_space<vmem>>, vector<64x32xbf16>
    %cst = arith.constant dense<0.000000e+00> : vector<16x32xf32>
    %6 = tpu.matmul %4, %5, %cst {dimension_numbers = #tpu.dot_dimension_numbers<[1], [0], [0], [1], [0, 0, 1, 1], [], []>} : vector<16x64xbf16>, vector<64x32xbf16>, vector<16x32xf32> -> vector<16x32xf32>
    %7 = arith.addf %3, %6 : vector<16x32xf32>
    %c0_6 = arith.constant 0 : index
    %c0_7 = arith.constant 0 : index
    %8 = vector.load %arg9[%c0_6, %c0_7] : memref<16x32xf32, #tpu.memory_space<vmem>>, vector<16x32xf32>
    tpu.vector_store %arg9[%c0_6, %c0_7], %7 {strides = array<i32>} : memref<16x32xf32, #tpu.memory_space<vmem>>, vector<16x32xf32>,
    %c0_i32_8 = arith.constant 0 : i32
    %9 = arith.cmpi eq, %arg1, %c0_i32_8 : i32
    %10 = arith.extui %9 : i1 to i32
    %c0_i32_9 = arith.constant 0 : i32
    %11 = arith.cmpi ne, %10, %c0_i32_9 : i32
    scf.if %11 {
      %c0_10 = arith.constant 0 : index
      %c0_11 = arith.constant 0 : index
      %12 = vector.load %arg9[%c0_10, %c0_11] : memref<16x32xf32, #tpu.memory_space<vmem>>, vector<16x32xf32>
      %c0_12 = arith.constant 0 : index
      %c0_13 = arith.constant 0 : index
      %13 = vector.load %arg4[%c0_12, %c0_13] : memref<1x32xf32, #tpu.memory_space<vmem>>, vector<1x32xf32>
      %14 = vector.broadcast %13 : vector<1x32xf32> to vector<16x32xf32>
      %15 = arith.addf %12, %14 : vector<16x32xf32>
      %c0_14 = arith.constant 0 : index
      %c0_15 = arith.constant 0 : index
      %16 = vector.load %arg5[%c0_14, %c0_15] : memref<16x32xbf16, #tpu.memory_space<vmem>>, vector<16x32xbf16>
      %17 = arith.extf %16 : vector<16x32xbf16> to vector<16x32xf32>
      %18 = arith.addf %15, %17 : vector<16x32xf32>
      %cst_16 = arith.constant dense<0.000000e+00> : vector<16xf32>
      %19 = vector.multi_reduction <add>, %18, %cst_16 [1] : vector<16x32xf32> to vector<16xf32>
      %20 = vector.shape_cast %19 : vector<16xf32> to vector<16x1xf32>
      %cst_17 = arith.constant 3.200000e+01 : f32
      %21 = vector.broadcast %cst_17 : f32 to vector<16x1xf32>
      %22 = arith.divf %20, %21 : vector<16x1xf32>
      %23 = vector.broadcast %22 : vector<16x1xf32> to vector<16x32xf32>
      %24 = arith.subf %18, %23 : vector<16x32xf32>
      %25 = vector.broadcast %22 : vector<16x1xf32> to vector<16x32xf32>
      %26 = arith.subf %18, %25 : vector<16x32xf32>
      %27 = arith.mulf %24, %26 : vector<16x32xf32>
      %cst_18 = arith.constant dense<0.000000e+00> : vector<16xf32>
      %28 = vector.multi_reduction <add>, %27, %cst_18 [1] : vector<16x32xf32> to vector<16xf32>
      %29 = vector.shape_cast %28 : vector<16xf32> to vector<16x1xf32>
      %cst_19 = arith.constant 3.200000e+01 : f32
      %30 = vector.broadcast %cst_19 : f32 to vector<16x1xf32>
      %31 = arith.divf %29, %30 : vector<16x1xf32>
      %32 = vector.broadcast %22 : vector<16x1xf32> to vector<16x32xf32>
      %33 = arith.subf %18, %32 : vector<16x32xf32>
      %cst_20 = arith.constant 9.99999996E-13 : f32
      %34 = vector.broadcast %cst_20 : f32 to vector<16x1xf32>
      %35 = arith.addf %31, %34 : vector<16x1xf32>
      %36 = math.rsqrt %35 : vector<16x1xf32>
      %37 = vector.broadcast %36 : vector<16x1xf32> to vector<16x32xf32>
      %38 = arith.mulf %33, %37 : vector<16x32xf32>
      %c0_21 = arith.constant 0 : index
      %c0_22 = arith.constant 0 : index
      %39 = vector.load %arg6[%c0_21, %c0_22] : memref<1x32xf32, #tpu.memory_space<vmem>>, vector<1x32xf32>
      %40 = vector.broadcast %39 : vector<1x32xf32> to vector<16x32xf32>
      %41 = arith.mulf %38, %40 : vector<16x32xf32>
      %c0_23 = arith.constant 0 : index
      %c0_24 = arith.constant 0 : index
      %42 = vector.load %arg7[%c0_23, %c0_24] : memref<1x32xf32, #tpu.memory_space<vmem>>, vector<1x32xf32>
      %43 = vector.broadcast %42 : vector<1x32xf32> to vector<16x32xf32>
      %44 = arith.addf %41, %43 : vector<16x32xf32>
      %45 = arith.truncf %44 : vector<16x32xf32> to vector<16x32xbf16>
      %c0_25 = arith.constant 0 : index
      %c0_26 = arith.constant 0 : index
      %46 = vector.load %arg8[%c0_25, %c0_26] : memref<16x32xbf16, #tpu.memory_space<vmem>>, vector<16x32xbf16>
      tpu.vector_store %arg8[%c0_25, %c0_26], %45 {strides = array<i32>} : memref<16x32xbf16, #tpu.memory_space<vmem>>, vector<16x32xbf16>,
    } else {
    }
    return
  }
  func.func @transform_0(%arg0: i32, %arg1: i32) -> (i32, i32) {
    %c0_i32 = arith.constant 0 : i32
    return %arg0, %arg1 : i32, i32
  }
  func.func @transform_1(%arg0: i32, %arg1: i32) -> (i32, i32) {
    %c0_i32 = arith.constant 0 : i32
    %c0_i32_0 = arith.constant 0 : i32
    return %arg1, %c0_i32 : i32, i32
  }
  func.func @transform_2(%arg0: i32, %arg1: i32) -> (i32, i32) {
    %c0_i32 = arith.constant 0 : i32
    %c0_i32_0 = arith.constant 0 : i32
    %c0_i32_1 = arith.constant 0 : i32
    return %c0_i32, %c0_i32_0 : i32, i32
  }
  func.func @transform_3(%arg0: i32, %arg1: i32) -> (i32, i32) {
    %c0_i32 = arith.constant 0 : i32
    %c0_i32_0 = arith.constant 0 : i32
    return %arg0, %c0_i32 : i32, i32
  }
  func.func @transform_4(%arg0: i32, %arg1: i32) -> (i32, i32) {
    %c0_i32 = arith.constant 0 : i32
    %c0_i32_0 = arith.constant 0 : i32
    %c0_i32_1 = arith.constant 0 : i32
    return %c0_i32, %c0_i32_0 : i32, i32
  }
  func.func @transform_5(%arg0: i32, %arg1: i32) -> (i32, i32) {
    %c0_i32 = arith.constant 0 : i32
    %c0_i32_0 = arith.constant 0 : i32
    %c0_i32_1 = arith.constant 0 : i32
    return %c0_i32, %c0_i32_0 : i32, i32
  }
  func.func @transform_6(%arg0: i32, %arg1: i32) -> (i32, i32) {
    %c0_i32 = arith.constant 0 : i32
    %c0_i32_0 = arith.constant 0 : i32
    return %arg0, %c0_i32 : i32, i32
  }
}

module attributes {stable_mosaic.version = 11 : i64} {
  func.func @_linear_kernel(%arg0: i32, %arg1: i32, %arg2: i32, %arg3: memref<16x32xbf16, #tpu.memory_space<vmem>>, %arg4: memref<32x64xbf16, #tpu.memory_space<vmem>>, %arg5: memref<1x64xf32, #tpu.memory_space<vmem>>, %arg6: memref<16x64xbf16, #tpu.memory_space<vmem>>, %arg7: memref<16x64xf32, #tpu.memory_space<vmem>>) attributes {dimension_semantics = [#tpu.dimension_semantics<parallel>, #tpu.dimension_semantics<parallel>, #tpu.dimension_semantics<arbitrary>], iteration_bounds = array<i64: 1, 1, 1>, scalar_prefetch = 0 : i64, scratch_operands = 1 : i64, tpu.core_type = #tpu.core_type<tc>, window_params = [{transform_indices = @transform_0, window_bounds = array<i64: 16, 32>}, {transform_indices = @transform_1, window_bounds = array<i64: 32, 64>}, {transform_indices = @transform_2, window_bounds = array<i64: 1, 64>}, {transform_indices = @transform_3, window_bounds = array<i64: 16, 64>}]} {
    %c0_i32 = arith.constant 0 : i32
    %0 = arith.cmpi eq, %arg2, %c0_i32 : i32
    %1 = arith.extui %0 : i1 to i32
    %c0_i32_0 = arith.constant 0 : i32
    %2 = arith.cmpi ne, %1, %c0_i32_0 : i32
    scf.if %2 {
      %cst_10 = arith.constant 0.000000e+00 : f32
      %12 = vector.broadcast %cst_10 : f32 to vector<16x64xf32>
      %c0_11 = arith.constant 0 : index
      %c0_12 = arith.constant 0 : index
      %13 = vector.load %arg7[%c0_11, %c0_12] : memref<16x64xf32, #tpu.memory_space<vmem>>, vector<16x64xf32>
      tpu.vector_store %arg7[%c0_11, %c0_12], %12 {strides = array<i32>} : memref<16x64xf32, #tpu.memory_space<vmem>>, vector<16x64xf32>,
    } else {
    }
    %c0 = arith.constant 0 : index
    %c0_1 = arith.constant 0 : index
    %3 = vector.load %arg7[%c0, %c0_1] : memref<16x64xf32, #tpu.memory_space<vmem>>, vector<16x64xf32>
    %c0_2 = arith.constant 0 : index
    %c0_3 = arith.constant 0 : index
    %4 = vector.load %arg3[%c0_2, %c0_3] : memref<16x32xbf16, #tpu.memory_space<vmem>>, vector<16x32xbf16>
    %c0_4 = arith.constant 0 : index
    %c0_5 = arith.constant 0 : index
    %5 = vector.load %arg4[%c0_4, %c0_5] : memref<32x64xbf16, #tpu.memory_space<vmem>>, vector<32x64xbf16>
    %cst = arith.constant dense<0.000000e+00> : vector<16x64xf32>
    %6 = tpu.matmul %4, %5, %cst {dimension_numbers = #tpu.dot_dimension_numbers<[1], [0], [0], [1], [0, 0, 1, 1], [], []>} : vector<16x32xbf16>, vector<32x64xbf16>, vector<16x64xf32> -> vector<16x64xf32>
    %7 = arith.addf %3, %6 : vector<16x64xf32>
    %c0_6 = arith.constant 0 : index
    %c0_7 = arith.constant 0 : index
    %8 = vector.load %arg7[%c0_6, %c0_7] : memref<16x64xf32, #tpu.memory_space<vmem>>, vector<16x64xf32>
    tpu.vector_store %arg7[%c0_6, %c0_7], %7 {strides = array<i32>} : memref<16x64xf32, #tpu.memory_space<vmem>>, vector<16x64xf32>,
    %c0_i32_8 = arith.constant 0 : i32
    %9 = arith.cmpi eq, %arg2, %c0_i32_8 : i32
    %10 = arith.extui %9 : i1 to i32
    %c0_i32_9 = arith.constant 0 : i32
    %11 = arith.cmpi ne, %10, %c0_i32_9 : i32
    scf.if %11 {
      %c0_10 = arith.constant 0 : index
      %c0_11 = arith.constant 0 : index
      %12 = vector.load %arg7[%c0_10, %c0_11] : memref<16x64xf32, #tpu.memory_space<vmem>>, vector<16x64xf32>
      %c0_12 = arith.constant 0 : index
      %c0_13 = arith.constant 0 : index
      %13 = vector.load %arg5[%c0_12, %c0_13] : memref<1x64xf32, #tpu.memory_space<vmem>>, vector<1x64xf32>
      %14 = vector.broadcast %13 : vector<1x64xf32> to vector<16x64xf32>
      %15 = arith.addf %12, %14 : vector<16x64xf32>
      %cst_14 = arith.constant 5.000000e-01 : f32
      %16 = vector.broadcast %cst_14 : f32 to vector<16x64xf32>
      %17 = arith.mulf %16, %15 : vector<16x64xf32>
      %cst_15 = arith.constant 4.471500e-02 : f32
      %18 = vector.broadcast %cst_15 : f32 to vector<16x64xf32>
      %19 = arith.mulf %18, %15 : vector<16x64xf32>
      %20 = arith.mulf %19, %15 : vector<16x64xf32>
      %21 = arith.mulf %20, %15 : vector<16x64xf32>
      %22 = arith.addf %15, %21 : vector<16x64xf32>
      %cst_16 = arith.constant 0.797884583 : f32
      %23 = vector.broadcast %cst_16 : f32 to vector<16x64xf32>
      %24 = arith.mulf %23, %22 : vector<16x64xf32>
      %25 = math.tanh %24 : vector<16x64xf32>
      %cst_17 = arith.constant 1.000000e+00 : f32
      %26 = vector.broadcast %cst_17 : f32 to vector<16x64xf32>
      %27 = arith.addf %26, %25 : vector<16x64xf32>
      %28 = arith.mulf %17, %27 : vector<16x64xf32>
      %29 = arith.truncf %28 : vector<16x64xf32> to vector<16x64xbf16>
      %c0_18 = arith.constant 0 : index
      %c0_19 = arith.constant 0 : index
      %30 = vector.load %arg6[%c0_18, %c0_19] : memref<16x64xbf16, #tpu.memory_space<vmem>>, vector<16x64xbf16>
      tpu.vector_store %arg6[%c0_18, %c0_19], %29 {strides = array<i32>} : memref<16x64xbf16, #tpu.memory_space<vmem>>, vector<16x64xbf16>,
    } else {
    }
    return
  }
  func.func @transform_0(%arg0: i32, %arg1: i32, %arg2: i32) -> (i32, i32) {
    %c0_i32 = arith.constant 0 : i32
    return %arg0, %arg2 : i32, i32
  }
  func.func @transform_1(%arg0: i32, %arg1: i32, %arg2: i32) -> (i32, i32) {
    %c0_i32 = arith.constant 0 : i32
    return %arg2, %arg1 : i32, i32
  }
  func.func @transform_2(%arg0: i32, %arg1: i32, %arg2: i32) -> (i32, i32) {
    %c0_i32 = arith.constant 0 : i32
    %c0_i32_0 = arith.constant 0 : i32
    return %c0_i32, %arg1 : i32, i32
  }
  func.func @transform_3(%arg0: i32, %arg1: i32, %arg2: i32) -> (i32, i32) {
    %c0_i32 = arith.constant 0 : i32
    return %arg0, %arg1 : i32, i32
  }
}

module attributes {stable_mosaic.version = 11 : i64} {
  func.func @_pooler_classifier_kernel(%arg0: i32, %arg1: memref<2x32xbf16, #tpu.memory_space<vmem>>, %arg2: memref<32x32xbf16, #tpu.memory_space<vmem>>, %arg3: memref<1x32xf32, #tpu.memory_space<vmem>>, %arg4: memref<32x128xbf16, #tpu.memory_space<vmem>>, %arg5: memref<1x128xf32, #tpu.memory_space<vmem>>, %arg6: memref<2x128xf32, #tpu.memory_space<vmem>>) attributes {dimension_semantics = [#tpu.dimension_semantics<arbitrary>], iteration_bounds = array<i64: 1>, scalar_prefetch = 0 : i64, scratch_operands = 0 : i64, tpu.core_type = #tpu.core_type<tc>, window_params = [{pipeline_mode = #tpu.pipeline_mode<synchronous>, transform_indices = @transform_0, window_bounds = array<i64: 2, 32>}, {pipeline_mode = #tpu.pipeline_mode<synchronous>, transform_indices = @transform_1, window_bounds = array<i64: 32, 32>}, {pipeline_mode = #tpu.pipeline_mode<synchronous>, transform_indices = @transform_2, window_bounds = array<i64: 1, 32>}, {pipeline_mode = #tpu.pipeline_mode<synchronous>, transform_indices = @transform_3, window_bounds = array<i64: 32, 128>}, {pipeline_mode = #tpu.pipeline_mode<synchronous>, transform_indices = @transform_4, window_bounds = array<i64: 1, 128>}, {pipeline_mode = #tpu.pipeline_mode<synchronous>, transform_indices = @transform_5, window_bounds = array<i64: 2, 128>}]} {
    %c0 = arith.constant 0 : index
    %c0_0 = arith.constant 0 : index
    %0 = vector.load %arg1[%c0, %c0_0] : memref<2x32xbf16, #tpu.memory_space<vmem>>, vector<2x32xbf16>
    %c0_1 = arith.constant 0 : index
    %c0_2 = arith.constant 0 : index
    %1 = vector.load %arg2[%c0_1, %c0_2] : memref<32x32xbf16, #tpu.memory_space<vmem>>, vector<32x32xbf16>
    %cst = arith.constant dense<0.000000e+00> : vector<2x32xf32>
    %2 = tpu.matmul %0, %1, %cst {dimension_numbers = #tpu.dot_dimension_numbers<[1], [0], [0], [1], [0, 0, 1, 1], [], []>} : vector<2x32xbf16>, vector<32x32xbf16>, vector<2x32xf32> -> vector<2x32xf32>
    %c0_3 = arith.constant 0 : index
    %c0_4 = arith.constant 0 : index
    %3 = vector.load %arg3[%c0_3, %c0_4] : memref<1x32xf32, #tpu.memory_space<vmem>>, vector<1x32xf32>
    %4 = vector.broadcast %3 : vector<1x32xf32> to vector<2x32xf32>
    %5 = arith.addf %2, %4 : vector<2x32xf32>
    %6 = math.tanh %5 : vector<2x32xf32>
    %7 = arith.truncf %6 : vector<2x32xf32> to vector<2x32xbf16>
    %c0_5 = arith.constant 0 : index
    %c0_6 = arith.constant 0 : index
    %8 = vector.load %arg4[%c0_5, %c0_6] : memref<32x128xbf16, #tpu.memory_space<vmem>>, vector<32x128xbf16>
    %cst_7 = arith.constant dense<0.000000e+00> : vector<2x128xf32>
    %9 = tpu.matmul %7, %8, %cst_7 {dimension_numbers = #tpu.dot_dimension_numbers<[1], [0], [0], [1], [0, 0, 1, 1], [], []>} : vector<2x32xbf16>, vector<32x128xbf16>, vector<2x128xf32> -> vector<2x128xf32>
    %c0_8 = arith.constant 0 : index
    %c0_9 = arith.constant 0 : index
    %10 = vector.load %arg5[%c0_8, %c0_9] : memref<1x128xf32, #tpu.memory_space<vmem>>, vector<1x128xf32>
    %11 = vector.broadcast %10 : vector<1x128xf32> to vector<2x128xf32>
    %12 = arith.addf %9, %11 : vector<2x128xf32>
    %c0_10 = arith.constant 0 : index
    %c0_11 = arith.constant 0 : index
    %13 = vector.load %arg6[%c0_10, %c0_11] : memref<2x128xf32, #tpu.memory_space<vmem>>, vector<2x128xf32>
    tpu.vector_store %arg6[%c0_10, %c0_11], %12 {strides = array<i32>} : memref<2x128xf32, #tpu.memory_space<vmem>>, vector<2x128xf32>,
    return
  }
  func.func @transform_0(%arg0: i32) -> (i32, i32) {
    %c0_i32 = arith.constant 0 : i32
    %c0_i32_0 = arith.constant 0 : i32
    %c0_i32_1 = arith.constant 0 : i32
    return %c0_i32, %c0_i32_0 : i32, i32
  }
  func.func @transform_1(%arg0: i32) -> (i32, i32) {
    %c0_i32 = arith.constant 0 : i32
    %c0_i32_0 = arith.constant 0 : i32
    %c0_i32_1 = arith.constant 0 : i32
    return %c0_i32, %c0_i32_0 : i32, i32
  }
  func.func @transform_2(%arg0: i32) -> (i32, i32) {
    %c0_i32 = arith.constant 0 : i32
    %c0_i32_0 = arith.constant 0 : i32
    %c0_i32_1 = arith.constant 0 : i32
    return %c0_i32, %c0_i32_0 : i32, i32
  }
  func.func @transform_3(%arg0: i32) -> (i32, i32) {
    %c0_i32 = arith.constant 0 : i32
    %c0_i32_0 = arith.constant 0 : i32
    %c0_i32_1 = arith.constant 0 : i32
    return %c0_i32, %c0_i32_0 : i32, i32
  }
  func.func @transform_4(%arg0: i32) -> (i32, i32) {
    %c0_i32 = arith.constant 0 : i32
    %c0_i32_0 = arith.constant 0 : i32
    %c0_i32_1 = arith.constant 0 : i32
    return %c0_i32, %c0_i32_0 : i32, i32
  }
  func.func @transform_5(%arg0: i32) -> (i32, i32) {
    %c0_i32 = arith.constant 0 : i32
    %c0_i32_0 = arith.constant 0 : i32
    %c0_i32_1 = arith.constant 0 : i32
    return %c0_i32, %c0_i32_0 : i32, i32
  }
}

</mosaic_0001>

<bundles_post_ra>
// kernel: bert_forward.12
= control target key start
LH: loop header
LB: loop body
LE: loop exit
PB: predicated region body
PF: predicated region fallthrough
CT: control target
= control target key end

     0   :  { %vm18_vm0 = vcmask 261120   ;;  %vm72_vm1 = vcmask 257024   ;;  %s132_s0 = inlined_call_operand.vmem [shape: bf16[16,32], index: 0, kind: input, shape index: {}]   ;;  %s133_s1 = inlined_call_operand.vmem [shape: f32[1,32], index: 1, kind: input, shape index: {}]   ;;  %s134_s2 = inlined_call_operand.vmem [shape: f32[1,32], index: 2, kind: input, shape index: {}]   ;;  %s135_s3 = inlined_call_operand.vmem [shape: bf16[16,32], index: 3, kind: output, shape index: {}]  }
   0x1   :  { %v86_v0 = vld [vmem:[%s132_s0] sm:$0xff]  }
   0x2   :  { %v87_v1 = vunpack.c.l.bf16 %v86_v0  ;;  %v88_v2 = vunpack.c.h.bf16 %v86_v0  ;;  %v79_v22 = vld [vmem:[%s133_s1] ss:$0 sm:$0xff] }
   0x3   :  { %v80_v24 = vld [vmem:[%s134_s2] ss:$0 sm:$0xff] }
   0x4   :  { %v19_v3 = vsel %vm18_vm0, %v87_v1, 0.0  ;;  %v22_v4 = vsel %vm18_vm0, %v88_v2, 0.0 }
   0x5   :  { %20 = vadd.xlane.f32.xlu0 %v19_v3 }
   0x9   :  { %23 = vadd.xlane.f32.xlu0 %v22_v4 }
  0x92   :  { %v21_v5 = vpop.xlane.xlu0 %20 }
  0x93   :  { %v26_v6 = vmul.f32 0.03125, %v21_v5 }
  0x95   :  { %v28_v7 = vsub.f32 %v87_v1, %v26_v6 }
  0x96   :  { %v24_v8 = vpop.xlane.xlu0 %23 }
  0x97   :  { %v27_v9 = vmul.f32 0.03125, %v24_v8  ;;  %v30_v10 = vmul.f32 %v28_v7, %v28_v7 }
  0x99   :  { %v29_v11 = vsub.f32 %v88_v2, %v27_v9  ;;  %v32_v12 = vsel %vm18_vm0, %v30_v10, 0.0 }
  0x9a   :  { %33 = vadd.xlane.f32.xlu1 %v32_v12 }
  0x9b   :  { %v31_v13 = vmul.f32 %v29_v11, %v29_v11 }
  0x9d   :  { %v35_v14 = vsel %vm18_vm0, %v31_v13, 0.0 }
  0x9e   :  { %36 = vadd.xlane.f32.xlu1 %v35_v14 }
 0x127   :  { %v34_v15 = vpop.xlane.xlu1 %33 }
 0x128   :  { %v38_v16 = vmul.f32 0.03125, %v34_v15 }
 0x12a   :  { %v40_v17 = vadd.f32 1e-12, %v38_v16 }
 0x12b   :  { %v37_v18 = vpop.xlane.xlu1 %36 }
 0x12c   :  { %89 = vrsqrt.f32 %v40_v17  ;;  %v39_v19 = vmul.f32 0.03125, %v37_v18 }
 0x12e   :  { %v41_v20 = vadd.f32 1e-12, %v39_v19 }
 0x130   :  { %91 = vrsqrt.f32 %v41_v20 }
 0x136   :  { %v90_v21 = vpop.eup %89 }
 0x137   :  { %v44_v23 = vmul.f32 %v90_v21, %v28_v7 }
 0x139   :  { %v53_v25 = vmul.f32 %v79_v22, %v44_v23 }
 0x13a   :  { %v92_v26 = vpop.eup %91 }
 0x13b   :  { %v62_v27 = vadd.f32 %v80_v24, %v53_v25  ;;  %v45_v28 = vmul.f32 %v92_v26, %v29_v11 }
 0x13d   :  { %v83_v29 = vpack.c.bf16 %v62_v27, %v62_v27  ;;  %v54_v30 = vmul.f32 %v79_v22, %v45_v28 }
 0x13f   :  { %73 = vst.msk [vmem:[%s135_s3] sm:$0xf] %vm72_vm1, %v83_v29  ;;  %v63_v31 = vadd.f32 %v80_v24, %v54_v30 }
 0x141   :  { %v84_v32 = vpack.c.bf16 %v63_v31, %v63_v31 }
 0x143   :  { %74 = vst.msk [vmem:[%s135_s3 + $0x4] sm:$0xf] %vm72_vm1, %v84_v32 }

// kernel: bert_forward.13
= control target key start
LH: loop header
LB: loop body
LE: loop exit
PB: predicated region body
PF: predicated region fallthrough
CT: control target
= control target key end

     0   :  { %vm19_vm0 = vcmask 785408   ;;  %v151_v0 = vmov 0.0   ;;  %vm152_vm1 = vmmov 0   ;;  %vm47_vm2 = vcmask 261120   ;;  %s195_s1 = inlined_call_operand.vmem [shape: bf16[32,96], index: 1, kind: input, shape index: {}]   ;;  %s196_s0 = inlined_call_operand.vmem [shape: bf16[16,32], index: 0, kind: input, shape index: {}]   ;;  %s197_s2 = inlined_call_operand.vmem [shape: f32[1,96], index: 2, kind: input, shape index: {}]   ;;  %s198_s3 = inlined_call_operand.vmem [shape: bf16[16,96], index: 3, kind: output, shape index: {}]  }
   0x1   :  { %138 = vmatprep.subr.bf16.mxu0 %v151_v0  ;;  %v148_v1 = vld [vmem:[%s195_s1] sm:$0xff]   ;;  %142 = vmatprep.mubr.msk.bf16.mxu0 %vm152_vm1, %v151_v0  ;;  %20 = vst.msk [vmem:[#allocation2] sm:$0xff] %vm19_vm0, %v151_v0  ;;  %21 = vst.msk [vmem:[#allocation2 + $0x8] sm:$0xff] %vm19_vm0, %v151_v0  ;;  %v149_v2 = vld [vmem:[%s195_s1 + $0x8] sm:$0xff]   ;;  %vm119_vm3 = vcmask 781312  }
   0x2   :  { %139 = vmatpush3.bf16.msra.mxu0 %v148_v1  ;;  %v150_v3 = vld [vmem:[%s196_s0] sm:$0xff]  }
   0x3   :  { %140 = vmatprep.subr.bf16.mxu0 %v151_v0  ;;  %v130_v12 = vld [vmem:[%s197_s2] ss:$0 sm:$0xff] }
   0x6   :  { %141 = vmatpush3.bf16.msra.mxu0 %v149_v2 }
   0x8   :  { %v22_v4 = vld [vmem:[#allocation2] sm:$0xff]  ;;  %v23_v6 = vld [vmem:[#allocation2 + $0x8] sm:$0xff] }
   0x9   :  { %143 = vmatmul.mubr.msk.bf16.vlgmr.msra.gmra.mrb[0].mxu0 %vm47_vm2, %v150_v3 }
  0xdc   :  { %v85_v5 = vpop.f32.mrb[0].mxu0 }
  0xdd   :  { %v92_v7 = vadd.f32 %v85_v5, %v22_v4  ;;  %v144_v8 = vpop.f32.mrb[1].mxu0 }
  0xde   :  { %v88_v9 = vpop.f32.mrb[2].mxu0 }
  0xdf   :  { %95 = vst.msk [vmem:[#allocation2] sm:$0xff] %vm19_vm0, %v92_v7  ;;  %v93_v10 = vadd.f32 %v88_v9, %v23_v6  ;;  %v145_v11 = vpop.f32.mrb[3].mxu0 }
  0xe1   :  { %96 = vst.msk [vmem:[#allocation2 + $0x8] sm:$0xff] %vm19_vm0, %v93_v10 }
  0xe6   :  { %v100_v13 = vld [vmem:[#allocation2] sm:$0xff] }
  0xe7   :  { %v109_v14 = vadd.f32 %v130_v12, %v100_v13 }
  0xe8   :  { %v101_v15 = vld [vmem:[#allocation2 + $0x8] sm:$0xff] }
  0xe9   :  { %v133_v16 = vpack.c.bf16 %v109_v14, %v109_v14  ;;  %v110_v17 = vadd.f32 %v130_v12, %v101_v15 }
  0xeb   :  { %120 = vst.msk [vmem:[%s198_s3] sm:$0xf] %vm119_vm3, %v133_v16  ;;  %v134_v18 = vpack.c.bf16 %v110_v17, %v110_v17 }
  0xed   :  { %121 = vst.msk [vmem:[%s198_s3 + $0x4] sm:$0xf] %vm119_vm3, %v134_v18 }

// kernel: bert_forward.14
= control target key start
LH: loop header
LB: loop body
LE: loop exit
PB: predicated region body
PF: predicated region fallthrough
CT: control target
= control target key end

     0   :  { %s565_s9 = smov 0   ;;  %s620_s0 = inlined_call_operand.vmem [shape: bf16[2,8,96], index: 0, kind: input, shape index: {}]   ;;  %s621_s1 = inlined_call_operand.vmem [shape: f32[2,1,8], index: 1, kind: input, shape index: {}]   ;;  %s622_s2 = inlined_call_operand.vmem [shape: bf16[2,8,32], index: 2, kind: output, shape index: {}]  }
   0x1 LB: > { %s460_s10 = sadd.s32 4294967295, %s540_s9   ;;  %p464_p0 = scmp.ge.s32.totalorder %s540_s9, 1  ;;  %s540_s9 = sphi %s565_s9, %s12_s9  }
   0x2   : > { %p119_p1 = scmp.lt.s32.totalorder %s540_s9, 3 }
   0x4   : > { %p120_p2 = pnand %p464_p0, %p119_p1 }
   0x5   : > { %p142_p3 = scmp.lt.s32.totalorder (!%p120_p2), %s460_s10, 1  ;;  %v542_v0 = vmov (!%p120_p2), 0.0   ;;  %vm543_vm0 = vmmov (!%p120_p2), 0   ;;  %s544_s15 = smov (!%p120_p2), 96   ;;  %vm167_vm1 = vcmask (!%p120_p2), 130048   ;;  %vm214_vm2 = vcmask (!%p120_p2), 64512  }
   0x6   : > { %123 = sbr.rel (%p120_p2) target bundleno = 1540 (0x604), region = 28  ;;  %485 = vmatprep.subr.bf16.mxu0 (!%p120_p2), %v542_v0  ;;  %487 = vmatprep.mubr.msk.bf16.mxu0 (!%p120_p2), %vm543_vm0, %v542_v0  ;;  %s545_s16 = smov (!%p120_p2), 64   ;;  %vm232_vm3 = vcmask (!%p120_p2), 1043456   ;;  %vm277_vm4 = vcmask (!%p120_p2), 125952   ;;  %vm396_vm5 = vcmask (!%p120_p2), 257152  }
   0x7   : > { %491 = vmatprep.subr.bf16.mxu1 (!%p120_p2), %v542_v0  ;;  %493 = vmatprep.mubr.msk.bf16.mxu1 (!%p120_p2), %vm543_vm0, %v542_v0  ;;  %s546_s20 = smov (!%p120_p2), 80   ;;  %s547_s21 = smov (!%p120_p2), 112  }
   0x8   : > { %s548_s25 = smov (!%p120_p2), 48   ;;  %s549_s26 = smov (!%p120_p2), 16  }
   0xd   : > { %s624_s10 = smov (!%p142_p3, %s460_s10), 1 }
   0xe   : > { %s465_s11 = sshll.u32 %s624_s10, 2  ;;  %s148_s19 = scalar_lea.vmem %s621_s1, %s624_s10 }
   0xf   : > { %s145_s14 = scalar_lea.vmem %s620_s0, %s465_s11  ;;  %v467_v5 = vld [vmem:[%s148_s19] ss:$0 sm:$0xff]  ;;  %s608_s24 = scalar_lea.vmem %s622_s2, %s465_s11 }
  0x10   : > { %v154_v1 = vld [vmem:[%s145_s14] sm:$0xf] }
  0x11   : > { %v583_v2 = vcombine.low %v154_v1, %v154_v1 }
  0x13   : > { %165 = vrot.lane.b32.xlu0 %v583_v2, %s544_s15  ;;  %227 = vrot.lane.b32.xlu1 %v583_v2, %s545_s16 }
  0x85   : > { %v166_v3 = vpop.permute.xlu0 %165  ;;  %v228_v12 = vpop.permute.xlu1 %227 }
  0x86   : > { %v172_v4 = vsel %vm167_vm1, %v166_v3, 0  ;;  %v234_v13 = vsel %vm232_vm3, %v228_v12, 0 }
  0x87   : > { %486 = vmatpush3.bf16.xpose.msra.mxu0 %v172_v4  ;;  %492 = vmatpush3.bf16.msra.mxu1 %v234_v13 }
  0x88   : > { %503 = vmatprep.subr.bf16.mxu0 %v542_v0  ;;  %497 = vmatprep.subr.bf16.mxu1 %v542_v0 }
  0x8e   : > { %488 = vmatmul.mubr.msk.bf16.vlgmr.msra.gmra.mrb[0].mxu0 %vm167_vm1, %v154_v1 }
  0x8f   : > { %505 = vmatprep.mubr.msk.bf16.mxu0 %vm543_vm0, %v542_v0 }
 0x161   : > { %v208_v6 = vpop.f32.mrb[0].mxu0 }
 0x162   : > { %v209_v7 = vadd.f32 %v467_v5, %v208_v6  ;;  %v489_v8 = vpop.f32.mrb[1].mxu0 }
 0x163   : > { %v211_v9 = vpop.f32.mrb[2].mxu0 }
 0x164   : > { %v490_v10 = vpop.f32.mrb[3].mxu0  ;;  %v215_v11 = vsel %vm214_vm2, %v209_v7, -inf }
 0x165   : > { %216 = vmax.xlane.f32.xlu0 %v215_v11 }
 0x1f2   : > { %v217_v14 = vpop.xlane.xlu0 %216 }
 0x1f3   : > { %v218_v15 = vsub.f32 %v209_v7, %v217_v14 }
 0x1f5   : > { %v219_v16 = vmul.f32 1.442695, %v218_v15 }
 0x1f7   : > { %526 = vpow2.f32 %v219_v16 }
 0x201   : > { %v527_v17 = vpop.eup %526 }
 0x202   : > { %v221_v18 = vsel %vm214_vm2, %v527_v17, 0.0 }
 0x203   : > { %222 = vadd.xlane.f32.xlu1 %v221_v18 }
 0x214   : > { %281 = vrot.lane.b32.xlu1 %v583_v2, %s546_s20 }
 0x218   : > { %279 = vrot.lane.b32.xlu1 %v583_v2, %s547_s21 }
 0x290   : > { %v223_v19 = vpop.xlane.xlu1 %222 }
 0x291   : > { %528 = vrcp.f32 %v223_v19 }
 0x294   : > { %v282_v21 = vpop.permute.xlu1 %281 }
 0x295   : > { %v287_v23 = vsel %vm167_vm1, %v282_v21, 0 }
 0x298   : > { %v280_v25 = vpop.permute.xlu1 %279 }
 0x29b   : > { %v529_v20 = vpop.eup %528 }
 0x29c   : > { %v225_v22 = vmul.f32 %v529_v20, %v527_v17 }
 0x29e   : > { %v226_v24 = vpack.c.bf16 %v225_v22, %v225_v22 }
 0x2a0   : > { %494 = vmatmul.mubr.msk.bf16.vlgmr.msra.gmra.mrb[0].mxu1 %vm214_vm2, %v226_v24 }
 0x2a1   : > { %498 = vmatpush3.bf16.xpose.msra.mxu1 %v287_v23  ;;  %499 = vmatprep.mubr.msk.bf16.mxu1 %vm543_vm0, %v542_v0 }
 0x2a8   : > { %500 = vmatmul.mubr.msk.bf16.vlgmr.msra.gmra.mrb[4].mxu1 %vm167_vm1, %v280_v25 }
 0x373   : > { %v270_v26 = vpop.f32.mrb[0].mxu1 }
 0x374   : > { %v276_v27 = vpack.c.bf16 %v270_v26, %v270_v26  ;;  %v495_v28 = vpop.f32.mrb[1].mxu1 }
 0x375   : > { %v273_v29 = vpop.f32.mrb[2].mxu1 }
 0x376   : > { %278 = vst.msk [vmem:[%s608_s24] sm:$0xf] %vm277_vm4, %v276_v27  ;;  %v496_v30 = vpop.f32.mrb[3].mxu1 }
 0x37b   : > { %v323_v31 = vpop.f32.mrb[4].mxu1 }
 0x37c   : > { %v324_v32 = vadd.f32 %v467_v5, %v323_v31  ;;  %v501_v33 = vpop.f32.mrb[5].mxu1 }
 0x37d   : > { %v326_v34 = vpop.f32.mrb[6].mxu1 }
 0x37e   : > { %v502_v35 = vpop.f32.mrb[7].mxu1  ;;  %v329_v36 = vsel %vm214_vm2, %v324_v32, -inf }
 0x37f   : > { %330 = vmax.xlane.f32.xlu1 %v329_v36 }
 0x40c   : > { %v331_v37 = vpop.xlane.xlu1 %330 }
 0x40d   : > { %v332_v38 = vsub.f32 %v324_v32, %v331_v37 }
 0x40f   : > { %v333_v39 = vmul.f32 1.442695, %v332_v38 }
 0x411   : > { %530 = vpow2.f32 %v333_v39 }
 0x41b   : > { %v531_v40 = vpop.eup %530 }
 0x41c   : > { %v335_v41 = vsel %vm214_vm2, %v531_v40, 0.0 }
 0x41d   : > { %336 = vadd.xlane.f32.xlu0 %v335_v41 }
 0x433   : > { %341 = vrot.lane.b32.xlu0 %v583_v2, %s548_s25 }
 0x4aa   : > { %v337_v42 = vpop.xlane.xlu0 %336 }
 0x4ab   : > { %532 = vrcp.f32 %v337_v42 }
 0x4ae   : > { %v342_v43 = vpop.permute.xlu0 %341 }
 0x4af   : > { %v347_v44 = vsel %vm232_vm3, %v342_v43, 0 }
 0x4b0   : > { %504 = vmatpush3.bf16.msra.mxu0 %v347_v44 }
 0x4b5   : > { %v533_v45 = vpop.eup %532 }
 0x4b6   : > { %v339_v46 = vmul.f32 %v533_v45, %v531_v40 }
 0x4b8   : > { %v340_v47 = vpack.c.bf16 %v339_v46, %v339_v46 }
 0x4ba   : > { %506 = vmatmul.mubr.msk.bf16.vlgmr.msra.gmra.mrb[4].mxu0 %vm214_vm2, %v340_v47 }
 0x58d   : > { %v383_v48 = vpop.f32.mrb[4].mxu0 }
 0x58e   : > { %v476_v49 = vpack.c.bf16 %v383_v48, %v383_v48  ;;  %v507_v50 = vpop.f32.mrb[5].mxu0 }
 0x58f   : > { %v386_v51 = vpop.f32.mrb[6].mxu0 }
 0x590   : > { %393 = vrot.lane.b32.xlu0 %v476_v49, %s549_s26  ;;  %v508_v52 = vpop.f32.mrb[7].mxu0 }
 0x602   : > { %v394_v53 = vpop.permute.xlu0 %393 }
 0x603   : > { %397 = vst.msk [vmem:[%s608_s24] sm:$0xf] %vm396_vm5, %v394_v53 }
 0x604 PF: > { %s12_s9 = sadd.s32 1, %s540_s9  }
 0x605   : > { %p9_p4 = scmp.ge.s32.totalorder %s12_s9, 4  }
 0x607   :  { %11 = sbr.rel (!%p9_p4) target bundleno = 1 (0x1), region = 61 }

// kernel: bert_forward.15
= control target key start
LH: loop header
LB: loop body
LE: loop exit
PB: predicated region body
PF: predicated region fallthrough
CT: control target
= control target key end

     0   :  { %vm28_vm0 = vcmask 261120   ;;  %v220_v0 = vmov 0.0   ;;  %vm221_vm1 = vmmov 0   ;;  %vm178_vm2 = vcmask 257024   ;;  %s293_s1 = inlined_call_operand.vmem [shape: bf16[32,32], index: 1, kind: input, shape index: {}]   ;;  %s294_s0 = inlined_call_operand.vmem [shape: bf16[16,32], index: 0, kind: input, shape index: {}]   ;;  %s295_s3 = inlined_call_operand.vmem [shape: bf16[16,32], index: 3, kind: input, shape index: {}]   ;;  %s296_s2 = inlined_call_operand.vmem [shape: f32[1,32], index: 2, kind: input, shape index: {}, may-alias: {2,5}]   ;;  %s297_s4 = inlined_call_operand.vmem [shape: f32[1,32], index: 4, kind: input, shape index: {}]   ;;  %s298_s5 = inlined_call_operand.vmem [shape: f32[1,32], index: 5, kind: input, shape index: {}, may-alias: {2,5}]   ;;  %s299_s6 = inlined_call_operand.vmem [shape: bf16[16,32], index: 6, kind: output, shape index: {}]  }
   0x1   :  { %203 = vmatprep.subr.bf16.mxu0 %v220_v0  ;;  %v213_v1 = vld [vmem:[%s293_s1] sm:$0xff]   ;;  %207 = vmatprep.mubr.msk.bf16.mxu0 %vm221_vm1, %v220_v0  ;;  %29 = vst.msk [vmem:[#allocation2] sm:$0xff] %vm28_vm0, %v220_v0  ;;  %30 = vst.msk [vmem:[#allocation2 + $0x8] sm:$0xff] %vm28_vm0, %v220_v0  ;;  %v214_v2 = vld [vmem:[%s293_s1 + $0x8] sm:$0xff]  }
   0x2   :  { %204 = vmatpush3.bf16.msra.mxu0 %v213_v1  ;;  %v215_v3 = vld [vmem:[%s294_s0] sm:$0xff]  }
   0x3   :  { %205 = vmatprep.subr.bf16.mxu0 %v220_v0  ;;  %v197_v12 = vld [vmem:[%s295_s3] sm:$0xff]  }
   0x4   :  { %v189_v13 = vld [vmem:[%s296_s2] ss:$0 sm:$0xff]  ;;  %v198_v14 = vunpack.c.l.bf16 %v197_v12  ;;  %v199_v17 = vunpack.c.h.bf16 %v197_v12 }
   0x5   :  { %v190_v41 = vld [vmem:[%s297_s4] ss:$0 sm:$0xff] }
   0x6   :  { %206 = vmatpush3.bf16.msra.mxu0 %v214_v2  ;;  %v191_v43 = vld [vmem:[%s298_s5] ss:$0 sm:$0xff] }
   0x8   :  { %v31_v4 = vld [vmem:[#allocation2] sm:$0xff]  ;;  %v32_v6 = vld [vmem:[#allocation2 + $0x8] sm:$0xff] }
   0x9   :  { %208 = vmatmul.mubr.msk.bf16.vlgmr.msra.gmra.mrb[0].mxu0 %vm28_vm0, %v215_v3 }
  0xdc   :  { %v94_v5 = vpop.f32.mrb[0].mxu0 }
  0xdd   :  { %v101_v7 = vadd.f32 %v94_v5, %v31_v4  ;;  %v209_v8 = vpop.f32.mrb[1].mxu0 }
  0xde   :  { %v97_v9 = vpop.f32.mrb[2].mxu0 }
  0xdf   :  { %103 = vst.msk [vmem:[#allocation2] sm:$0xff] %vm28_vm0, %v101_v7  ;;  %v102_v10 = vadd.f32 %v97_v9, %v32_v6  ;;  %v210_v11 = vpop.f32.mrb[3].mxu0 }
  0xe1   :  { %104 = vst.msk [vmem:[#allocation2 + $0x8] sm:$0xff] %vm28_vm0, %v102_v10 }
  0xe6   :  { %v108_v15 = vld [vmem:[#allocation2] sm:$0xff] }
  0xe7   :  { %v117_v16 = vadd.f32 %v189_v13, %v108_v15 }
  0xe8   :  { %v109_v18 = vld [vmem:[#allocation2 + $0x8] sm:$0xff] }
  0xe9   :  { %v123_v19 = vadd.f32 %v198_v14, %v117_v16  ;;  %v118_v20 = vadd.f32 %v189_v13, %v109_v18 }
  0xeb   :  { %v125_v21 = vsel %vm28_vm0, %v123_v19, 0.0  ;;  %v124_v22 = vadd.f32 %v199_v17, %v118_v20 }
  0xec   :  { %126 = vadd.xlane.f32.xlu0 %v125_v21 }
  0xed   :  { %v128_v23 = vsel %vm28_vm0, %v124_v22, 0.0 }
  0xf0   :  { %129 = vadd.xlane.f32.xlu0 %v128_v23 }
 0x179   :  { %v127_v24 = vpop.xlane.xlu0 %126 }
 0x17a   :  { %v132_v25 = vmul.f32 0.03125, %v127_v24 }
 0x17c   :  { %v134_v26 = vsub.f32 %v123_v19, %v132_v25 }
 0x17d   :  { %v130_v27 = vpop.xlane.xlu0 %129 }
 0x17e   :  { %v133_v28 = vmul.f32 0.03125, %v130_v27  ;;  %v136_v29 = vmul.f32 %v134_v26, %v134_v26 }
 0x180   :  { %v135_v30 = vsub.f32 %v124_v22, %v133_v28  ;;  %v138_v31 = vsel %vm28_vm0, %v136_v29, 0.0 }
 0x181   :  { %139 = vadd.xlane.f32.xlu1 %v138_v31 }
 0x182   :  { %v137_v32 = vmul.f32 %v135_v30, %v135_v30 }
 0x184   :  { %v141_v33 = vsel %vm28_vm0, %v137_v32, 0.0 }
 0x185   :  { %142 = vadd.xlane.f32.xlu1 %v141_v33 }
 0x20e   :  { %v140_v34 = vpop.xlane.xlu1 %139 }
 0x20f   :  { %v144_v35 = vmul.f32 0.03125, %v140_v34 }
 0x211   :  { %v146_v36 = vadd.f32 1e-12, %v144_v35 }
 0x212   :  { %v143_v37 = vpop.xlane.xlu1 %142 }
 0x213   :  { %216 = vrsqrt.f32 %v146_v36  ;;  %v145_v38 = vmul.f32 0.03125, %v143_v37 }
 0x215   :  { %v147_v39 = vadd.f32 1e-12, %v145_v38 }
 0x217   :  { %218 = vrsqrt.f32 %v147_v39 }
 0x21d   :  { %v217_v40 = vpop.eup %216 }
 0x21e   :  { %v150_v42 = vmul.f32 %v217_v40, %v134_v26 }
 0x220   :  { %v159_v44 = vmul.f32 %v190_v41, %v150_v42 }
 0x221   :  { %v219_v45 = vpop.eup %218 }
 0x222   :  { %v168_v46 = vadd.f32 %v191_v43, %v159_v44  ;;  %v151_v47 = vmul.f32 %v219_v45, %v135_v30 }
 0x224   :  { %v194_v48 = vpack.c.bf16 %v168_v46, %v168_v46  ;;  %v160_v49 = vmul.f32 %v190_v41, %v151_v47 }
 0x226   :  { %179 = vst.msk [vmem:[%s299_s6] sm:$0xf] %vm178_vm2, %v194_v48  ;;  %v169_v50 = vadd.f32 %v191_v43, %v160_v49 }
 0x228   :  { %v195_v51 = vpack.c.bf16 %v169_v50, %v169_v50 }
 0x22a   :  { %180 = vst.msk [vmem:[%s299_s6 + $0x4] sm:$0xf] %vm178_vm2, %v195_v51 }

// kernel: bert_forward.17
= control target key start
LH: loop header
LB: loop body
LE: loop exit
PB: predicated region body
PF: predicated region fallthrough
CT: control target
= control target key end

     0   :  { %vm28_vm0 = vcmask 261120   ;;  %v247_v0 = vmov 0.0   ;;  %vm248_vm1 = vmmov 0   ;;  %vm72_vm2 = vcmask 523264   ;;  %s325_s1 = inlined_call_operand.vmem [shape: bf16[64,32], index: 1, kind: input, shape index: {}]   ;;  %s326_s0 = inlined_call_operand.vmem [shape: bf16[16,64], index: 0, kind: input, shape index: {}]   ;;  %s327_s3 = inlined_call_operand.vmem [shape: bf16[16,32], index: 3, kind: input, shape index: {}]   ;;  %s328_s2 = inlined_call_operand.vmem [shape: f32[1,32], index: 2, kind: input, shape index: {}, may-alias: {2,5}]   ;;  %s329_s4 = inlined_call_operand.vmem [shape: f32[1,32], index: 4, kind: input, shape index: {}]   ;;  %s330_s5 = inlined_call_operand.vmem [shape: f32[1,32], index: 5, kind: input, shape index: {}, may-alias: {2,5}]   ;;  %s331_s6 = inlined_call_operand.vmem [shape: bf16[16,32], index: 6, kind: output, shape index: {}]  }
   0x1   :  { %224 = vmatprep.subr.bf16.mxu0 %v247_v0  ;;  %v238_v1 = vld [vmem:[%s325_s1] sm:$0xff]   ;;  %232 = vmatprep.mubr.msk.bf16.mxu0 %vm248_vm1, %v247_v0  ;;  %29 = vst.msk [vmem:[#allocation2] sm:$0xff] %vm28_vm0, %v247_v0  ;;  %30 = vst.msk [vmem:[#allocation2 + $0x8] sm:$0xff] %vm28_vm0, %v247_v0  ;;  %v239_v2 = vld [vmem:[%s325_s1 + $0x8] sm:$0xff]   ;;  %vm195_vm3 = vcmask 257024  }
   0x2   :  { %225 = vmatpush3.bf16.msra.mxu0 %v238_v1  ;;  %v240_v3 = vld [vmem:[%s325_s1 + $0x10] sm:$0xff]   ;;  %v241_v4 = vld [vmem:[%s325_s1 + $0x18] sm:$0xff]   ;;  %v242_v5 = vld [vmem:[%s326_s0] sm:$0xff]  }
   0x3   :  { %226 = vmatprep.subr.bf16.mxu0 %v247_v0  ;;  %v216_v14 = vld [vmem:[%s327_s3] sm:$0xff]  }
   0x4   :  { %v208_v15 = vld [vmem:[%s328_s2] ss:$0 sm:$0xff]  ;;  %v217_v16 = vunpack.c.l.bf16 %v216_v14  ;;  %v218_v19 = vunpack.c.h.bf16 %v216_v14 }
   0x5   :  { %v209_v43 = vld [vmem:[%s329_s4] ss:$0 sm:$0xff] }
   0x6   :  { %227 = vmatpush3.bf16.msra.mxu0 %v239_v2  ;;  %v210_v45 = vld [vmem:[%s330_s5] ss:$0 sm:$0xff] }
   0x7   :  { %228 = vmatprep.subr.bf16.mxu0 %v247_v0 }
   0x8   :  { %v31_v6 = vld [vmem:[#allocation2] sm:$0xff]  ;;  %v32_v8 = vld [vmem:[#allocation2 + $0x8] sm:$0xff] }
   0xa   :  { %229 = vmatpush3.bf16.msra.mxu0 %v240_v3 }
   0xb   :  { %230 = vmatprep.subr.bf16.mxu0 %v247_v0 }
   0xe   :  { %231 = vmatpush3.bf16.msra.mxu0 %v241_v4 }
  0x11   :  { %233 = vmatmul.mubr.msk.bf16.vlgmr.msra.gmra.mrb[0].mxu0 %vm72_vm2, %v242_v5 }
  0xe4   :  { %v110_v7 = vpop.f32.mrb[0].mxu0 }
  0xe5   :  { %v117_v9 = vadd.f32 %v110_v7, %v31_v6  ;;  %v234_v10 = vpop.f32.mrb[1].mxu0 }
  0xe6   :  { %v113_v11 = vpop.f32.mrb[2].mxu0 }
  0xe7   :  { %120 = vst.msk [vmem:[#allocation2] sm:$0xff] %vm28_vm0, %v117_v9  ;;  %v118_v12 = vadd.f32 %v113_v11, %v32_v8  ;;  %v235_v13 = vpop.f32.mrb[3].mxu0 }
  0xe9   :  { %121 = vst.msk [vmem:[#allocation2 + $0x8] sm:$0xff] %vm28_vm0, %v118_v12 }
  0xee   :  { %v125_v17 = vld [vmem:[#allocation2] sm:$0xff] }
  0xef   :  { %v134_v18 = vadd.f32 %v208_v15, %v125_v17 }
  0xf0   :  { %v126_v20 = vld [vmem:[#allocation2 + $0x8] sm:$0xff] }
  0xf1   :  { %v140_v21 = vadd.f32 %v217_v16, %v134_v18  ;;  %v135_v22 = vadd.f32 %v208_v15, %v126_v20 }
  0xf3   :  { %v142_v23 = vsel %vm28_vm0, %v140_v21, 0.0  ;;  %v141_v24 = vadd.f32 %v218_v19, %v135_v22 }
  0xf4   :  { %143 = vadd.xlane.f32.xlu0 %v142_v23 }
  0xf5   :  { %v145_v25 = vsel %vm28_vm0, %v141_v24, 0.0 }
  0xf8   :  { %146 = vadd.xlane.f32.xlu0 %v145_v25 }
 0x181   :  { %v144_v26 = vpop.xlane.xlu0 %143 }
 0x182   :  { %v149_v27 = vmul.f32 0.03125, %v144_v26 }
 0x184   :  { %v151_v28 = vsub.f32 %v140_v21, %v149_v27 }
 0x185   :  { %v147_v29 = vpop.xlane.xlu0 %146 }
 0x186   :  { %v150_v30 = vmul.f32 0.03125, %v147_v29  ;;  %v153_v31 = vmul.f32 %v151_v28, %v151_v28 }
 0x188   :  { %v152_v32 = vsub.f32 %v141_v24, %v150_v30  ;;  %v155_v33 = vsel %vm28_vm0, %v153_v31, 0.0 }
 0x189   :  { %156 = vadd.xlane.f32.xlu1 %v155_v33 }
 0x18a   :  { %v154_v34 = vmul.f32 %v152_v32, %v152_v32 }
 0x18c   :  { %v158_v35 = vsel %vm28_vm0, %v154_v34, 0.0 }
 0x18d   :  { %159 = vadd.xlane.f32.xlu1 %v158_v35 }
 0x216   :  { %v157_v36 = vpop.xlane.xlu1 %156 }
 0x217   :  { %v161_v37 = vmul.f32 0.03125, %v157_v36 }
 0x219   :  { %v163_v38 = vadd.f32 1e-12, %v161_v37 }
 0x21a   :  { %v160_v39 = vpop.xlane.xlu1 %159 }
 0x21b   :  { %243 = vrsqrt.f32 %v163_v38  ;;  %v162_v40 = vmul.f32 0.03125, %v160_v39 }
 0x21d   :  { %v164_v41 = vadd.f32 1e-12, %v162_v40 }
 0x21f   :  { %245 = vrsqrt.f32 %v164_v41 }
 0x225   :  { %v244_v42 = vpop.eup %243 }
 0x226   :  { %v167_v44 = vmul.f32 %v244_v42, %v151_v28 }
 0x228   :  { %v176_v46 = vmul.f32 %v209_v43, %v167_v44 }
 0x229   :  { %v246_v47 = vpop.eup %245 }
 0x22a   :  { %v185_v48 = vadd.f32 %v210_v45, %v176_v46  ;;  %v168_v49 = vmul.f32 %v246_v47, %v152_v32 }
 0x22c   :  { %v213_v50 = vpack.c.bf16 %v185_v48, %v185_v48  ;;  %v177_v51 = vmul.f32 %v209_v43, %v168_v49 }
 0x22e   :  { %196 = vst.msk [vmem:[%s331_s6] sm:$0xf] %vm195_vm3, %v213_v50  ;;  %v186_v52 = vadd.f32 %v210_v45, %v177_v51 }
 0x230   :  { %v214_v53 = vpack.c.bf16 %v186_v52, %v186_v52 }
 0x232   :  { %197 = vst.msk [vmem:[%s331_s6 + $0x4] sm:$0xf] %vm195_vm3, %v214_v53 }

// kernel: bert_forward.16
= control target key start
LH: loop header
LB: loop body
LE: loop exit
PB: predicated region body
PF: predicated region fallthrough
CT: control target
= control target key end

     0   :  { %vm19_vm0 = vcmask 523264   ;;  %v173_v0 = vmov 0.0   ;;  %vm174_vm1 = vmmov 0   ;;  %vm47_vm2 = vcmask 261120   ;;  %s217_s1 = inlined_call_operand.vmem [shape: bf16[32,64], index: 1, kind: input, shape index: {}]   ;;  %s218_s0 = inlined_call_operand.vmem [shape: bf16[16,32], index: 0, kind: input, shape index: {}]   ;;  %s219_s2 = inlined_call_operand.vmem [shape: f32[1,64], index: 2, kind: input, shape index: {}]   ;;  %s220_s3 = inlined_call_operand.vmem [shape: bf16[16,64], index: 3, kind: output, shape index: {}]  }
   0x1   :  { %156 = vmatprep.subr.bf16.mxu0 %v173_v0  ;;  %v166_v1 = vld [vmem:[%s217_s1] sm:$0xff]   ;;  %160 = vmatprep.mubr.msk.bf16.mxu0 %vm174_vm1, %v173_v0  ;;  %20 = vst.msk [vmem:[#allocation2] sm:$0xff] %vm19_vm0, %v173_v0  ;;  %21 = vst.msk [vmem:[#allocation2 + $0x8] sm:$0xff] %vm19_vm0, %v173_v0  ;;  %v167_v2 = vld [vmem:[%s217_s1 + $0x8] sm:$0xff]   ;;  %vm137_vm3 = vcmask 519168  }
   0x2   :  { %157 = vmatpush3.bf16.msra.mxu0 %v166_v1  ;;  %v168_v3 = vld [vmem:[%s218_s0] sm:$0xff]  }
   0x3   :  { %158 = vmatprep.subr.bf16.mxu0 %v173_v0  ;;  %v148_v12 = vld [vmem:[%s219_s2] ss:$0 sm:$0xff] }
   0x6   :  { %159 = vmatpush3.bf16.msra.mxu0 %v167_v2 }
   0x8   :  { %v22_v4 = vld [vmem:[#allocation2] sm:$0xff]  ;;  %v23_v6 = vld [vmem:[#allocation2 + $0x8] sm:$0xff] }
   0x9   :  { %161 = vmatmul.mubr.msk.bf16.vlgmr.msra.gmra.mrb[0].mxu0 %vm47_vm2, %v168_v3 }
  0xdc   :  { %v85_v5 = vpop.f32.mrb[0].mxu0 }
  0xdd   :  { %v92_v7 = vadd.f32 %v85_v5, %v22_v4  ;;  %v162_v8 = vpop.f32.mrb[1].mxu0 }
  0xde   :  { %v88_v9 = vpop.f32.mrb[2].mxu0 }
  0xdf   :  { %95 = vst.msk [vmem:[#allocation2] sm:$0xff] %vm19_vm0, %v92_v7  ;;  %v93_v10 = vadd.f32 %v88_v9, %v23_v6  ;;  %v163_v11 = vpop.f32.mrb[3].mxu0 }
  0xe1   :  { %96 = vst.msk [vmem:[#allocation2 + $0x8] sm:$0xff] %vm19_vm0, %v93_v10 }
  0xe6   :  { %v100_v13 = vld [vmem:[#allocation2] sm:$0xff] }
  0xe7   :  { %v109_v14 = vadd.f32 %v148_v12, %v100_v13 }
  0xe8   :  { %v101_v15 = vld [vmem:[#allocation2 + $0x8] sm:$0xff] }
  0xe9   :  { %v113_v16 = vmul.f32 0.044715, %v109_v14  ;;  %v110_v17 = vadd.f32 %v148_v12, %v101_v15  ;;  %v111_v28 = vmul.f32 0.5, %v109_v14 }
  0xeb   :  { %v115_v18 = vmul.f32 %v113_v16, %v109_v14  ;;  %v114_v19 = vmul.f32 0.044715, %v110_v17  ;;  %v112_v32 = vmul.f32 0.5, %v110_v17 }
  0xed   :  { %v117_v20 = vmul.f32 %v115_v18, %v109_v14  ;;  %v116_v21 = vmul.f32 %v114_v19, %v110_v17 }
  0xef   :  { %v119_v22 = vadd.f32 %v117_v20, %v109_v14  ;;  %v118_v23 = vmul.f32 %v116_v21, %v110_v17 }
  0xf1   :  { %v121_v24 = vmul.f32 0.7978846, %v119_v22  ;;  %v120_v25 = vadd.f32 %v118_v23, %v110_v17 }
  0xf3   :  { %169 = vtanh.f32 %v121_v24  ;;  %v122_v26 = vmul.f32 0.7978846, %v120_v25 }
  0xf5   :  { %171 = vtanh.f32 %v122_v26 }
  0xfd   :  { %v170_v27 = vpop.eup %169 }
  0xfe   :  { %v125_v29 = vadd.f32 1.0, %v170_v27 }
  0xff   :  { %v172_v30 = vpop.eup %171 }
 0x100   :  { %v127_v31 = vmul.f32 %v125_v29, %v111_v28  ;;  %v126_v33 = vadd.f32 1.0, %v172_v30 }
 0x102   :  { %v151_v34 = vpack.c.bf16 %v127_v31, %v127_v31  ;;  %v128_v35 = vmul.f32 %v126_v33, %v112_v32 }
 0x104   :  { %138 = vst.msk [vmem:[%s220_s3] sm:$0xf] %vm137_vm3, %v151_v34  ;;  %v152_v36 = vpack.c.bf16 %v128_v35, %v128_v35 }
 0x106   :  { %139 = vst.msk [vmem:[%s220_s3 + $0x4] sm:$0xf] %vm137_vm3, %v152_v36 }

// kernel: bert_forward.23
= control target key start
LH: loop header
LB: loop body
LE: loop exit
PB: predicated region body
PF: predicated region fallthrough
CT: control target
= control target key end

     0   :  { %v236_v1 = vmov 0.0   ;;  %vm237_vm0 = vmmov 0   ;;  %s304_s0 = inlined_call_operand.vmem [shape: bf16[2,32], index: 0, kind: input, shape index: {}]   ;;  %s305_s1 = inlined_call_operand.vmem [shape: bf16[32,32], index: 1, kind: input, shape index: {}]   ;;  %s306_s2 = inlined_call_operand.vmem [shape: f32[1,32], index: 2, kind: input, shape index: {}]   ;;  %s307_s3 = inlined_call_operand.vmem [shape: bf16[32,128], index: 3, kind: input, shape index: {}]   ;;  %s308_s4 = inlined_call_operand.vmem [shape: f32[1,128], index: 4, kind: input, shape index: {}]   ;;  %s309_s5 = inlined_call_operand.hbm [shape: f32[2,128], index: 5, kind: output, shape index: {}]  }
   0x1   :  { %v206_v0 = vld [vmem:[%s305_s1] sm:$0xff]   ;;  %187 = vmatprep.subr.bf16.mxu0 %v236_v1  ;;  %195 = vmatprep.subr.bf16.mxu1 %v236_v1  ;;  %v207_v2 = vld [vmem:[%s305_s1 + $0x8] sm:$0xff]  }
   0x2   :  { %188 = vmatpush3.bf16.msra.mxu0 %v206_v0  ;;  %191 = vmatprep.mubr.msk.bf16.mxu0 %vm237_vm0, %v236_v1 }
   0x3   :  { %189 = vmatprep.subr.bf16.mxu0 %v236_v1  ;;  %199 = vmatprep.mubr.msk.bf16.mxu1 %vm237_vm0, %v236_v1 }
   0x4   :  { %10 = vsyncpa [#allocation3], 0  ;;  %v22_v3 = vld [vmem:[%s304_s0] sm:$0x1]  ;;  %vm46_vm1 = vcmask 261120   ;;  %v209_v5 = vld [vmem:[%s307_s3 + $0x8] sm:$0xff]  }
   0x5   :  { %v208_v4 = vld [vmem:[%s307_s3] sm:$0xff]   ;;  %s238_s3 = smov [#allocation2]  }
   0x6   :  { %190 = vmatpush3.bf16.msra.mxu0 %v207_v2  ;;  %196 = vmatpush3.bf16.msra.mxu1 %v208_v4  ;;  %v173_v6 = vld [vmem:[%s306_s2] ss:$0 sm:$0xff]  ;;  %s165_s30 = sshll.u32 %s238_s3, 4  ;;  %s166_s30 = int_to_ptr.vmem [resolvable:$true] %s165_s30 }
   0x7   :  { %197 = vmatprep.subr.bf16.mxu1 %v236_v1  ;;  %v177_v14 = vld [vmem:[%s308_s4] ss:$0 sm:$0xff]  ;;  %s212_s2 = scalar_lea.vmem %s166_s30, 32  ;;  %p217_p1 = scmp.lt.s32.totalorder %s166_s30, %s166_s30 }
   0x8   :  { %p213_p0 = scmp.ne.s32.totalorder %s166_s30, %s212_s2  ;;  %p218_p2 = scmp.lt.s32.totalorder %s212_s2, %s212_s2 }
   0x9   :  { %192 = vmatmul.mubr.msk.bf16.vlgmr.msra.gmra.mrb[0].mxu0 %vm46_vm1, %v22_v3 }
   0xa   :  { %198 = vmatpush3.bf16.msra.mxu1 %v209_v5  ;;  %p219_p3 = por %p218_p2, %p217_p1 }
   0xc   :  { %p220_p4 = pnand %p219_p3, %p213_p0 }
  0xdc   :  { %v84_v7 = vpop.f32.mrb[0].mxu0 }
  0xdd   :  { %v85_v8 = vadd.f32 %v173_v6, %v84_v7  ;;  %v193_v9 = vpop.f32.mrb[1].mxu0 }
  0xde   :  { %v87_v10 = vpop.f32.mrb[2].mxu0 }
  0xdf   :  { %210 = vtanh.f32 %v85_v8  ;;  %v194_v11 = vpop.f32.mrb[3].mxu0 }
  0xe9   :  { %v211_v12 = vpop.eup %210 }
  0xea   :  { %v91_v13 = vpack.c.bf16 %v211_v12, %v211_v12 }
  0xec   :  { %200 = vmatmul.mubr.msk.bf16.vlgmr.msra.gmra.mrb[0].mxu1 %vm46_vm1, %v91_v13 }
 0x1bf   :  { %v152_v15 = vpop.f32.mrb[0].mxu1 }
 0x1c0   :  { %v153_v16 = vadd.f32 %v177_v14, %v152_v15  ;;  %v201_v17 = vpop.f32.mrb[1].mxu1 }
 0x1c1   :  { %v155_v18 = vpop.f32.mrb[2].mxu1 }
 0x1c2   :  { %158 = vst [vmem:[#allocation2] sm:$0x3] %v153_v16  ;;  %v202_v19 = vpop.f32.mrb[3].mxu1 }
 0x1c3   :  { %223 = shalt.err (!%p220_p4)
}
 0x1c4   :  { %s224_s4 = scalar_lea.hbm %s309_s5, 32 }
 0x1c5   :  { %p225_p5 = scmp.ne.s32.totalorder %s309_s5, %s224_s4  ;;  %p228_p6 = scmp.lt.u32.totalorder %s224_s4, %s309_s5 }
 0x1c7   :  { %p230_p7 = pnand %p228_p6, %p225_p5 }
 0x1c9   :  { %233 = shalt.err (!%p230_p7)
}
 0x1ca   :  { %168 = dma.vmem_to_hbm [thread:$0]  %s166_s30, 32, %s309_s5, [#allocation3]  }
 0x1cb   :  { %234 = dma.done.wait [#allocation3], 32  }
 0x1cc   :  { %235 = vsyncadd [#allocation3], 4294967264 }
 0x1cd   :  { %172 = vsyncpa [#allocation3], 1 }

</bundles_post_ra>
